<compile_context>
chip_gen: v7x
topology: tpu7x:2x2x1
jax: 0.10.0
libtpu: 0.0.40
codegen_flags: <defaults>
</compile_context>

<pallas_src>
import jax
import jax.numpy as jnp
from jax.experimental import pallas as pl
from jax.experimental.pallas import tpu as pltpu


def _round_up(x, m):
    return (x + m - 1) // m * m


def _vmem_budget():
    """Generation-aware VMEM limit: ~80% of physical, capped at 100 MiB."""
    try:
        cap = int(pltpu.get_tpu_info().vmem_capacity_bytes)
    except Exception:
        cap = 64 * 1024 * 1024  # conservative (v7x-sized) fallback, safe everywhere
    return min(int(cap * 0.8), 100 * 1024 * 1024)


def _resident_spec(shape):
    """BlockSpec for a grid-invariant (weight / shift) operand.

    The block index never changes, so a second pipeline buffer is pure VMEM
    waste (matters most inside v7x's 64 MiB); single-buffer when supported."""
    index_map = lambda b, k, _s=shape: (0,) * len(_s)
    try:
        return pl.BlockSpec(shape, index_map, pipeline_mode=pl.Buffered(1))
    except Exception:  # older JAX without pipeline_mode / Buffered
        return pl.BlockSpec(shape, index_map)


def _pick_tiles(B, N, budget_rows, gran, max_bt=8):
    """Returns (bt, n_tile, needs_mask).

    bt         : batch rows fused per grid step (only with whole-N tiles)
    n_tile     : points per grid step per batch row
    needs_mask : True if the last point tile is partial (cdiv grid + masking)."""
    if N <= budget_rows:
        bt = 1
        if B > 1 and 2 * N <= budget_rows:
            want = min(B, max_bt, budget_rows // N)
            # Keep >= 2 blocks on the parallel batch axis: with whole-N fat
            # tiles this costs at most one extra grid step on 1-TC chips
            # (v5e/v6e) while enabling the megacore split on 2-TC chips (v7x).
            want = min(want, max(1, B // 2))
            for d in range(want, 0, -1):
                if B % d == 0:
                    bt = d
                    break
        return bt, N, False
    cap = max(gran, (min(budget_rows, 4096) // gran) * gran)
    n_tile = 0
    t = cap
    while t >= gran:
        if N % t == 0:
            n_tile = t
            break
        t -= gran
    if n_tile >= max(gran, cap // 2):
        return 1, n_tile, False          # clean divisor found
    return 1, cap, True                  # cdiv grid + in-kernel tail masking


def _make_sa_kernel(n_layers, bt, n_tile, n_total, needs_mask, pts_on_mxu,
                    compute_dtype, c_in):
    """Folded-BN 1x1-conv MLP + running global max over the point axis."""
    n_params = 3 + 2 * (n_layers - 1)

    def kernel(xyz_ref, pts_ref, *rest):
        params = rest[:n_params]
        out_ref = rest[n_params]          # (bt, 1, D_pad) f32, resident over k

        w_xyz = params[0][...]            # (3, c1_pad)  f32
        w_pts = params[1][...]            # (C, c1_pad)  f32 (VPU) / compute dtype (MXU)
        shift0 = params[2][...]           # (1, c1_pad)  f32

        @pl.when(pl.program_id(1) == 0)
        def _init():
            # -inf is the true identity of max (do not rely on the final ReLU).
            out_ref[...] = jnp.full(out_ref.shape, -jnp.inf, out_ref.dtype)

        for j in range(bt):               # static unroll over fused batch rows
            xyz_t = xyz_ref[j]            # (n_tile, 3) f32
            pts_t = pts_ref[j]            # (n_tile, C) compute dtype

            # ---- layer 1: unpadded narrow input channels ----
            if pts_on_mxu:
                h = jnp.dot(pts_t, w_pts, preferred_element_type=jnp.float32)
            else:
                pts_f = pts_t.astype(jnp.float32)
                h = pts_f[:, 0:1] * w_pts[0:1, :]
                for c in range(1, c_in):
                    h = h + pts_f[:, c:c + 1] * w_pts[c:c + 1, :]
            for c in range(3):            # xyz always via VPU MACs, in f32
                h = h + xyz_t[:, c:c + 1] * w_xyz[c:c + 1, :]
            h = jnp.maximum(h + shift0, 0.0)

            # ---- layers 2..L: lane-aligned MXU matmuls, f32 accumulation ----
            for l in range(1, n_layers):
                w = params[3 + 2 * (l - 1)][...]
                shift = params[4 + 2 * (l - 1)][...]
                if compute_dtype != jnp.float32:
                    h = h.astype(compute_dtype)
                h = jnp.dot(h, w, preferred_element_type=jnp.float32)
                h = jnp.maximum(h + shift, 0.0)

            # ---- mask padded tail rows (partial last tile only) ----
            if needs_mask:
                row0 = pl.program_id(1) * n_tile
                rows = row0 + jax.lax.broadcasted_iota(jnp.int32, (n_tile, 1), 0)
                h = jnp.where(rows < n_total, h, -jnp.inf)

            # ---- running max over the point axis ----
            tile_max = jnp.max(h, axis=0, keepdims=True)        # (1, D_pad)
            out_ref[j] = jnp.maximum(out_ref[j], tile_max)

    return kernel


def set_abstraction_forward(xyz, points, params, npoint,
                            compute_dtype=jnp.bfloat16,
                            max_rows_per_step=None):
    """
    group_all=True forward.

    xyz:    (B, N, 3)  float32
    points: (B, C, N)  float32
    params: list (one per mlp layer) of dicts with
            conv_w (out,in), conv_b (out,), bn_gamma/bn_beta/bn_mean/bn_var (out,)
    returns:
      new_xyz:    (B, N, npoint, 3)
      new_points: (B, D_last, 1)   global feature after MLP + max pool
    """
    B, N, _ = xyz.shape
    C = points.shape[1]
    assert C >= 1, "in_channel must be >= 1"
    eps = 1e-5
    cd_bytes = jnp.dtype(compute_dtype).itemsize

    # Point-feature contraction on the MXU only when C is a substantial,
    # well-trodden contraction dim; tiny C goes through cheap VPU MACs.
    pts_on_mxu = C >= 64

    # ---- inputs: channels-last, UNPADDED ----
    xyz_in = xyz.astype(jnp.float32)                        # geometry stays f32
    pts_in = jnp.transpose(points, (0, 2, 1)).astype(compute_dtype)   # (B, N, C)

    # ---- fold Conv bias + BatchNorm (running stats) into (W, shift) ----
    flat_params, param_shapes = [], []

    p0 = params[0]
    c1 = p0["conv_w"].shape[0]
    c1_pad = _round_up(c1, 128)
    w0 = jnp.transpose(p0["conv_w"], (1, 0)).astype(jnp.float32)      # (3+C, c1)
    scale0 = p0["bn_gamma"] / jnp.sqrt(p0["bn_var"] + eps)
    shift0 = p0["conv_b"] * scale0 + p0["bn_beta"] - p0["bn_mean"] * scale0
    w0 = w0 * scale0[None, :]
    w_xyz = jnp.zeros((3, c1_pad), jnp.float32).at[:, :c1].set(w0[:3])
    w_pts = jnp.zeros((C, c1_pad), jnp.float32).at[:, :c1].set(w0[3:])
    if pts_on_mxu:
        w_pts = w_pts.astype(compute_dtype)
    shift0_pad = jnp.zeros((1, c1_pad), jnp.float32).at[0, :c1].set(shift0)
    flat_params += [w_xyz, w_pts, shift0_pad]
    param_shapes += [(3, c1_pad), (C, c1_pad), (1, c1_pad)]

    prev_pad = c1_pad
    for p in params[1:]:
        cout, cin = p["conv_w"].shape
        cout_pad = _round_up(cout, 128)
        w = jnp.transpose(p["conv_w"], (1, 0)).astype(jnp.float32)    # (cin, cout)
        scale = p["bn_gamma"] / jnp.sqrt(p["bn_var"] + eps)
        shift = p["conv_b"] * scale + p["bn_beta"] - p["bn_mean"] * scale
        w = w * scale[None, :]
        w_pad = jnp.zeros((prev_pad, cout_pad), jnp.float32).at[:cin, :cout].set(w)
        shift_pad = jnp.zeros((1, cout_pad), jnp.float32).at[0, :cout].set(shift)
        flat_params += [w_pad.astype(compute_dtype), shift_pad]
        param_shapes += [(prev_pad, cout_pad), (1, cout_pad)]
        prev_pad = cout_pad

    d_out = params[-1]["conv_w"].shape[0]
    d_out_pad = prev_pad
    max_cout_pad = max(s[-1] for s in param_shapes)

    # ---- VMEM budget -> rows per grid step ----
    vmem_limit = _vmem_budget()
    weight_bytes = sum(int(a.size) * a.dtype.itemsize for a in flat_params)
    # per-row bytes: double-buffered xyz (lane-padded in VMEM, f32) + pts blocks
    # plus peak f32/narrow intermediate activations of the widest layer.
    row_bytes = (2 * 128 * 4 + 2 * _round_up(C, 128) * cd_bytes
                 + max_cout_pad * (8 + cd_bytes))
    budget = vmem_limit - 2 * weight_bytes - 6 * 1024 * 1024
    budget_rows = max(256, budget // row_bytes)
    if max_rows_per_step is not None:
        budget_rows = min(budget_rows, int(max_rows_per_step))

    gran = 16  # sublane granularity safe for f32 and packed bf16 tiles
    bt, n_tile, needs_mask = _pick_tiles(B, N, budget_rows, gran)
    grid_b = B // bt
    grid_n = pl.cdiv(N, n_tile) if needs_mask else N // n_tile

    in_specs = [
        pl.BlockSpec((bt, n_tile, 3), lambda b, k: (b, k, 0)),
        pl.BlockSpec((bt, n_tile, C), lambda b, k: (b, k, 0)),
    ] + [_resident_spec(s) for s in param_shapes]

    out = pl.pallas_call(
        _make_sa_kernel(len(params), bt, n_tile, N, needs_mask, pts_on_mxu,
                        compute_dtype, C),
        out_shape=jax.ShapeDtypeStruct((B, 1, d_out_pad), jnp.float32),
        grid=(grid_b, grid_n),
        in_specs=in_specs,
        out_specs=pl.BlockSpec((bt, 1, d_out_pad), lambda b, k: (b, 0, 0)),
        compiler_params=pltpu.CompilerParams(
            dimension_semantics=("parallel", "arbitrary"),
            vmem_limit_bytes=int(vmem_limit),
        ),
    )(xyz_in, pts_in, *flat_params)

    new_points = out[:, 0, :d_out, None]                    # (B, D, 1)
    # glue: new_xyz exactly as the module's group_all branch returns it.
    new_xyz = jnp.broadcast_to(xyz[:, :, None, :], (B, N, npoint, 3))
    return new_xyz, new_points


def init_params(key, in_channel, mlp):
    """Deterministic synthetic parameters (Conv2d 1x1 + BatchNorm2d per layer)."""
    params = []
    last = in_channel + 3
    for out_c in mlp:
        k1, k2, k3, k4, k5, key = jax.random.split(key, 6)
        params.append(dict(
            conv_w=0.2 * jax.random.normal(k1, (out_c, last), jnp.float32),
            conv_b=0.05 * jax.random.normal(k2, (out_c,), jnp.float32),
            bn_gamma=1.0 + 0.1 * jax.random.normal(k3, (out_c,), jnp.float32),
            bn_beta=0.05 * jax.random.normal(k4, (out_c,), jnp.float32),
            bn_mean=0.02 * jax.random.normal(k5, (out_c,), jnp.float32),
            bn_var=jnp.ones((out_c,), jnp.float32) * 1.1,
        ))
        last = out_c
    return params


def reference_forward(xyz, points, params):
    """Pure-JAX f32 (highest-precision matmul) reference of the same semantics."""
    eps = 1e-5
    x = jnp.concatenate([xyz, jnp.transpose(points, (0, 2, 1))], axis=-1)
    for p in params:
        x = jnp.einsum("bnc,oc->bno", x, p["conv_w"],
                       precision=jax.lax.Precision.HIGHEST) + p["conv_b"]
        x = (x - p["bn_mean"]) / jnp.sqrt(p["bn_var"] + eps) * p["bn_gamma"] + p["bn_beta"]
        x = jnp.maximum(x, 0.0)
    return jnp.max(x, axis=1)  # (B, D)


if __name__ == "__main__":
    key = jax.random.PRNGKey(0)
    kx, kp, kw = jax.random.split(key, 3)

    B, N, C = 2, 128, 4
    npoint = 4
    mlp = [32, 64]

    xyz = jax.random.normal(kx, (B, N, 3), jnp.float32)
    points = jax.random.normal(kp, (B, C, N), jnp.float32)
    params = init_params(kw, C, mlp)
    ref = reference_forward(xyz, points, params)

    # 1) f32, whole-N-per-step path.
    new_xyz, np_f32 = set_abstraction_forward(
        xyz, points, params, npoint, compute_dtype=jnp.float32)
    new_xyz, np_f32 = jax.block_until_ready((new_xyz, np_f32))
    assert new_xyz.shape == (B, N, npoint, 3)
    assert np_f32.shape == (B, mlp[-1], 1)
    assert jnp.allclose(np_f32[:, :, 0], ref, rtol=1e-3, atol=1e-3), \
        "f32 whole-N mismatch vs reference"

    # 2) f32, multi-tile running-max reduction (N split into divisor tiles).
    _, np_tiled = set_abstraction_forward(
        xyz, points, params, npoint, compute_dtype=jnp.float32, max_rows_per_step=48)
    np_tiled = jax.block_until_ready(np_tiled)
    assert jnp.allclose(np_tiled[:, :, 0], ref, rtol=1e-3, atol=1e-3), \
        "f32 tiled mismatch vs reference"

    # 3) f32, cdiv grid with masked partial tail tile (N not a tile multiple).
    N2 = 120
    xyz2, points2 = xyz[:, :N2], points[:, :, :N2]
    ref2 = reference_forward(xyz2, points2, params)
    _, np_mask = set_abstraction_forward(
        xyz2, points2, params, npoint, compute_dtype=jnp.float32, max_rows_per_step=48)
    np_mask = jax.block_until_ready(np_mask)
    assert jnp.allclose(np_mask[:, :, 0], ref2, rtol=1e-3, atol=1e-3), \
        "masked-tail mismatch vs reference"

    # 4) default production path (bfloat16 features, f32 accumulation/epilogue).
    _, np_bf16 = set_abstraction_forward(xyz, points, params, npoint)
    np_bf16 = jax.block_until_ready(np_bf16)
    assert np_bf16.shape == (B, mlp[-1], 1)
    assert jnp.allclose(np_bf16[:, :, 0], ref, rtol=5e-2, atol=5e-2), \
        "bf16 mismatch vs reference"

    print("KERNEL_OK")
</pallas_src>

<mosaic_0001>
module attributes {stable_mosaic.version = 11 : i64} {
  func.func @kernel(%arg0: i32, %arg1: i32, %arg2: memref<1x128x3xf32, #tpu.memory_space<vmem>>, %arg3: memref<1x128x4xf32, #tpu.memory_space<vmem>>, %arg4: memref<3x128xf32, #tpu.memory_space<vmem>>, %arg5: memref<4x128xf32, #tpu.memory_space<vmem>>, %arg6: memref<1x128xf32, #tpu.memory_space<vmem>>, %arg7: memref<128x128xf32, #tpu.memory_space<vmem>>, %arg8: memref<1x128xf32, #tpu.memory_space<vmem>>, %arg9: memref<1x1x128xf32, #tpu.memory_space<vmem>>) attributes {dimension_semantics = [#tpu.dimension_semantics<parallel>, #tpu.dimension_semantics<arbitrary>], iteration_bounds = array<i64: 2, 1>, scalar_prefetch = 0 : i64, scratch_operands = 0 : i64, tpu.core_type = #tpu.core_type<tc>, window_params = [{transform_indices = @transform_0, window_bounds = array<i64: 1, 128, 3>}, {transform_indices = @transform_1, window_bounds = array<i64: 1, 128, 4>}, {pipeline_mode = #tpu.pipeline_mode<synchronous>, transform_indices = @transform_2, window_bounds = array<i64: 3, 128>}, {pipeline_mode = #tpu.pipeline_mode<synchronous>, transform_indices = @transform_3, window_bounds = array<i64: 4, 128>}, {pipeline_mode = #tpu.pipeline_mode<synchronous>, transform_indices = @transform_4, window_bounds = array<i64: 1, 128>}, {pipeline_mode = #tpu.pipeline_mode<synchronous>, transform_indices = @transform_5, window_bounds = array<i64: 128, 128>}, {pipeline_mode = #tpu.pipeline_mode<synchronous>, transform_indices = @transform_6, window_bounds = array<i64: 1, 128>}, {transform_indices = @transform_7, window_bounds = array<i64: 1, 1, 128>}]} {
    %c0 = arith.constant 0 : index
    %c0_0 = arith.constant 0 : index
    %0 = vector.load %arg4[%c0, %c0_0] : memref<3x128xf32, #tpu.memory_space<vmem>>, vector<3x128xf32>
    %c0_1 = arith.constant 0 : index
    %c0_2 = arith.constant 0 : index
    %1 = vector.load %arg5[%c0_1, %c0_2] : memref<4x128xf32, #tpu.memory_space<vmem>>, vector<4x128xf32>
    %c0_3 = arith.constant 0 : index
    %c0_4 = arith.constant 0 : index
    %2 = vector.load %arg6[%c0_3, %c0_4] : memref<1x128xf32, #tpu.memory_space<vmem>>, vector<1x128xf32>
    %c0_i32 = arith.constant 0 : i32
    %3 = arith.cmpi eq, %arg1, %c0_i32 : i32
    %4 = arith.extui %3 : i1 to i32
    %c0_i32_5 = arith.constant 0 : i32
    %5 = arith.cmpi ne, %4, %c0_i32_5 : i32
    scf.if %5 {
      %cst_25 = arith.constant 0xFF800000 : f32
      %70 = vector.broadcast %cst_25 : f32 to vector<1x1x128xf32>
      %c0_26 = arith.constant 0 : index
      %c0_27 = arith.constant 0 : index
      %c0_28 = arith.constant 0 : index
      %71 = vector.load %arg9[%c0_26, %c0_27, %c0_28] : memref<1x1x128xf32, #tpu.memory_space<vmem>>, vector<1x1x128xf32>
      tpu.vector_store %arg9[%c0_26, %c0_27, %c0_28], %70 {strides = array<i32>} : memref<1x1x128xf32, #tpu.memory_space<vmem>>, vector<1x1x128xf32>,
    } else {
    }
    %c0_6 = arith.constant 0 : index
    %c0_7 = arith.constant 0 : index
    %c0_8 = arith.constant 0 : index
    %6 = vector.load %arg2[%c0_6, %c0_7, %c0_8] : memref<1x128x3xf32, #tpu.memory_space<vmem>>, vector<1x128x3xf32>
    %7 = vector.shape_cast %6 : vector<1x128x3xf32> to vector<128x3xf32>
    %c0_9 = arith.constant 0 : index
    %c0_10 = arith.constant 0 : index
    %c0_11 = arith.constant 0 : index
    %8 = vector.load %arg3[%c0_9, %c0_10, %c0_11] : memref<1x128x4xf32, #tpu.memory_space<vmem>>, vector<1x128x4xf32>
    %9 = vector.shape_cast %8 : vector<1x128x4xf32> to vector<128x4xf32>
    %10 = vector.extract_strided_slice %9 {offsets = [0, 0], sizes = [128, 1], strides = [1, 1]} : vector<128x4xf32> to vector<128x1xf32>
    %11 = vector.extract_strided_slice %1 {offsets = [0, 0], sizes = [1, 128], strides = [1, 1]} : vector<4x128xf32> to vector<1x128xf32>
    %12 = vector.broadcast %10 : vector<128x1xf32> to vector<128x128xf32>
    %13 = vector.broadcast %11 : vector<1x128xf32> to vector<128x128xf32>
    %14 = arith.mulf %12, %13 : vector<128x128xf32>
    %15 = vector.extract_strided_slice %9 {offsets = [0, 1], sizes = [128, 1], strides = [1, 1]} : vector<128x4xf32> to vector<128x1xf32>
    %16 = vector.extract_strided_slice %1 {offsets = [1, 0], sizes = [1, 128], strides = [1, 1]} : vector<4x128xf32> to vector<1x128xf32>
    %17 = vector.broadcast %15 : vector<128x1xf32> to vector<128x128xf32>
    %18 = vector.broadcast %16 : vector<1x128xf32> to vector<128x128xf32>
    %19 = arith.mulf %17, %18 : vector<128x128xf32>
    %20 = arith.addf %14, %19 : vector<128x128xf32>
    %21 = vector.extract_strided_slice %9 {offsets = [0, 2], sizes = [128, 1], strides = [1, 1]} : vector<128x4xf32> to vector<128x1xf32>
    %22 = vector.extract_strided_slice %1 {offsets = [2, 0], sizes = [1, 128], strides = [1, 1]} : vector<4x128xf32> to vector<1x128xf32>
    %23 = vector.broadcast %21 : vector<128x1xf32> to vector<128x128xf32>
    %24 = vector.broadcast %22 : vector<1x128xf32> to vector<128x128xf32>
    %25 = arith.mulf %23, %24 : vector<128x128xf32>
    %26 = arith.addf %20, %25 : vector<128x128xf32>
    %27 = vector.extract_strided_slice %9 {offsets = [0, 3], sizes = [128, 1], strides = [1, 1]} : vector<128x4xf32> to vector<128x1xf32>
    %28 = vector.extract_strided_slice %1 {offsets = [3, 0], sizes = [1, 128], strides = [1, 1]} : vector<4x128xf32> to vector<1x128xf32>
    %29 = vector.broadcast %27 : vector<128x1xf32> to vector<128x128xf32>
    %30 = vector.broadcast %28 : vector<1x128xf32> to vector<128x128xf32>
    %31 = arith.mulf %29, %30 : vector<128x128xf32>
    %32 = arith.addf %26, %31 : vector<128x128xf32>
    %33 = vector.extract_strided_slice %7 {offsets = [0, 0], sizes = [128, 1], strides = [1, 1]} : vector<128x3xf32> to vector<128x1xf32>
    %34 = vector.extract_strided_slice %0 {offsets = [0, 0], sizes = [1, 128], strides = [1, 1]} : vector<3x128xf32> to vector<1x128xf32>
    %35 = vector.broadcast %33 : vector<128x1xf32> to vector<128x128xf32>
    %36 = vector.broadcast %34 : vector<1x128xf32> to vector<128x128xf32>
    %37 = arith.mulf %35, %36 : vector<128x128xf32>
    %38 = arith.addf %32, %37 : vector<128x128xf32>
    %39 = vector.extract_strided_slice %7 {offsets = [0, 1], sizes = [128, 1], strides = [1, 1]} : vector<128x3xf32> to vector<128x1xf32>
    %40 = vector.extract_strided_slice %0 {offsets = [1, 0], sizes = [1, 128], strides = [1, 1]} : vector<3x128xf32> to vector<1x128xf32>
    %41 = vector.broadcast %39 : vector<128x1xf32> to vector<128x128xf32>
    %42 = vector.broadcast %40 : vector<1x128xf32> to vector<128x128xf32>
    %43 = arith.mulf %41, %42 : vector<128x128xf32>
    %44 = arith.addf %38, %43 : vector<128x128xf32>
    %45 = vector.extract_strided_slice %7 {offsets = [0, 2], sizes = [128, 1], strides = [1, 1]} : vector<128x3xf32> to vector<128x1xf32>
    %46 = vector.extract_strided_slice %0 {offsets = [2, 0], sizes = [1, 128], strides = [1, 1]} : vector<3x128xf32> to vector<1x128xf32>
    %47 = vector.broadcast %45 : vector<128x1xf32> to vector<128x128xf32>
    %48 = vector.broadcast %46 : vector<1x128xf32> to vector<128x128xf32>
    %49 = arith.mulf %47, %48 : vector<128x128xf32>
    %50 = arith.addf %44, %49 : vector<128x128xf32>
    %51 = vector.broadcast %2 : vector<1x128xf32> to vector<128x128xf32>
    %52 = arith.addf %50, %51 : vector<128x128xf32>
    %cst = arith.constant 0.000000e+00 : f32
    %53 = vector.broadcast %cst : f32 to vector<128x128xf32>
    %54 = arith.maximumf %52, %53 : vector<128x128xf32>
    %c0_12 = arith.constant 0 : index
    %c0_13 = arith.constant 0 : index
    %55 = vector.load %arg7[%c0_12, %c0_13] : memref<128x128xf32, #tpu.memory_space<vmem>>, vector<128x128xf32>
    %c0_14 = arith.constant 0 : index
    %c0_15 = arith.constant 0 : index
    %56 = vector.load %arg8[%c0_14, %c0_15] : memref<1x128xf32, #tpu.memory_space<vmem>>, vector<1x128xf32>
    %cst_16 = arith.constant dense<0.000000e+00> : vector<128x128xf32>
    %57 = tpu.matmul %54, %55, %cst_16 {dimension_numbers = #tpu.dot_dimension_numbers<[1], [0], [0], [1], [0, 0, 1, 1], [], []>} : vector<128x128xf32>, vector<128x128xf32>, vector<128x128xf32> -> vector<128x128xf32>
    %58 = vector.broadcast %56 : vector<1x128xf32> to vector<128x128xf32>
    %59 = arith.addf %57, %58 : vector<128x128xf32>
    %cst_17 = arith.constant 0.000000e+00 : f32
    %60 = vector.broadcast %cst_17 : f32 to vector<128x128xf32>
    %61 = arith.maximumf %59, %60 : vector<128x128xf32>
    %cst_18 = arith.constant dense<0xFF800000> : vector<128xf32>
    %62 = vector.multi_reduction <maximumf>, %61, %cst_18 [0] : vector<128x128xf32> to vector<128xf32>
    %63 = vector.shape_cast %62 : vector<128xf32> to vector<1x128xf32>
    %c0_19 = arith.constant 0 : index
    %c0_20 = arith.constant 0 : index
    %c0_21 = arith.constant 0 : index
    %64 = vector.load %arg9[%c0_19, %c0_20, %c0_21] : memref<1x1x128xf32, #tpu.memory_space<vmem>>, vector<1x1x128xf32>
    %65 = vector.shape_cast %64 : vector<1x1x128xf32> to vector<1x128xf32>
    %66 = arith.maximumf %65, %63 : vector<1x128xf32>
    %c0_22 = arith.constant 0 : index
    %c0_23 = arith.constant 0 : index
    %c0_24 = arith.constant 0 : index
    %67 = vector.load %arg9[%c0_22, %c0_23, %c0_24] : memref<1x1x128xf32, #tpu.memory_space<vmem>>, vector<1x1x128xf32>
    %68 = vector.shape_cast %67 : vector<1x1x128xf32> to vector<1x128xf32>
    %69 = vector.shape_cast %66 : vector<1x128xf32> to vector<1x1x128xf32>
    tpu.vector_store %arg9[%c0_22, %c0_23, %c0_24], %69 {strides = array<i32>} : memref<1x1x128xf32, #tpu.memory_space<vmem>>, vector<1x1x128xf32>,
    return
  }
  func.func @transform_0(%arg0: i32, %arg1: i32) -> (i32, i32, i32) {
    %c0_i32 = arith.constant 0 : i32
    %c0_i32_0 = arith.constant 0 : i32
    return %arg0, %arg1, %c0_i32 : i32, i32, i32
  }
  func.func @transform_1(%arg0: i32, %arg1: i32) -> (i32, i32, i32) {
    %c0_i32 = arith.constant 0 : i32
    %c0_i32_0 = arith.constant 0 : i32
    return %arg0, %arg1, %c0_i32 : i32, i32, i32
  }
  func.func @transform_2(%arg0: i32, %arg1: i32) -> (i32, i32) {
    %c0_i32 = arith.constant 0 : i32
    %c0_i32_0 = arith.constant 0 : i32
    %c0_i32_1 = arith.constant 0 : i32
    return %c0_i32, %c0_i32_0 : i32, i32
  }
  func.func @transform_3(%arg0: i32, %arg1: i32) -> (i32, i32) {
    %c0_i32 = arith.constant 0 : i32
    %c0_i32_0 = arith.constant 0 : i32
    %c0_i32_1 = arith.constant 0 : i32
    return %c0_i32, %c0_i32_0 : i32, i32
  }
  func.func @transform_4(%arg0: i32, %arg1: i32) -> (i32, i32) {
    %c0_i32 = arith.constant 0 : i32
    %c0_i32_0 = arith.constant 0 : i32
    %c0_i32_1 = arith.constant 0 : i32
    return %c0_i32, %c0_i32_0 : i32, i32
  }
  func.func @transform_5(%arg0: i32, %arg1: i32) -> (i32, i32) {
    %c0_i32 = arith.constant 0 : i32
    %c0_i32_0 = arith.constant 0 : i32
    %c0_i32_1 = arith.constant 0 : i32
    return %c0_i32, %c0_i32_0 : i32, i32
  }
  func.func @transform_6(%arg0: i32, %arg1: i32) -> (i32, i32) {
    %c0_i32 = arith.constant 0 : i32
    %c0_i32_0 = arith.constant 0 : i32
    %c0_i32_1 = arith.constant 0 : i32
    return %c0_i32, %c0_i32_0 : i32, i32
  }
  func.func @transform_7(%arg0: i32, %arg1: i32) -> (i32, i32, i32) {
    %c0_i32 = arith.constant 0 : i32
    %c0_i32_0 = arith.constant 0 : i32
    %c0_i32_1 = arith.constant 0 : i32
    return %arg0, %c0_i32, %c0_i32_0 : i32, i32, i32
  }
}

</mosaic_0001>

<bundles_post_ra>
// kernel: tpu_custom_call.1
= control target key start
LH: loop header
LB: loop body
LE: loop exit
PB: predicated region body
PF: predicated region fallthrough
CT: control target
= control target key end

     0   :  { %12 = vsyncpa [#allocation3], 0  ;;  %s2610_s0 = inlined_call_operand.vmem [shape: f32[2,128,3], index: 0, kind: input, shape index: {}]   ;;  %s2611_s1 = inlined_call_operand.vmem [shape: f32[2,128,4], index: 1, kind: input, shape index: {}]   ;;  %s2612_s2 = inlined_call_operand.vmem [shape: f32[3,128], index: 2, kind: input, shape index: {}]   ;;  %s2613_s3 = inlined_call_operand.vmem [shape: f32[4,128], index: 3, kind: input, shape index: {}]   ;;  %s2614_s4 = inlined_call_operand.vmem [shape: f32[1,128], index: 4, kind: input, shape index: {}]   ;;  %s2615_s5 = inlined_call_operand.vmem [shape: f32[128,128], index: 5, kind: input, shape index: {}]   ;;  %s2616_s6 = inlined_call_operand.vmem [shape: f32[1,128], index: 6, kind: input, shape index: {}]   ;;  %s2617_s7 = inlined_call_operand.hbm [shape: f32[2,1,128], index: 7, kind: output, shape index: {}]  }
   0x1   :  { %14 = vsyncpa [#allocation3 + $0x1], 0  ;;  %s1823_s24 = smov 0   ;;  %s1825_s25 = smov 0  }
   0x2   :  { %s1827_s26 = smov 0   ;;  %s1829_s27 = smov 0  }
   0x3   :  { %s1831_s28 = smov 0   ;;  %s1833_s29 = smov 0  }
   0x4 LB: > { %s1442_s30 = sadd.s32 4294967295, %s1775_s29   ;;  %s1443_s8 = sadd.s32 4294967294, %s1775_s29   ;;  %s1775_s29 = sphi %s1833_s29, %s20_s29   ;;  %s1771_s28 = sphi %s1831_s28, %s2646_s28   ;;  %s1767_s27 = sphi %s1829_s27, %s2645_s27   ;;  %s1763_s26 = sphi %s1827_s26, %s2644_s26   ;;  %s1759_s25 = sphi %s1825_s25, %s2643_s25   ;;  %s1755_s24 = sphi %s1823_s24, %s2642_s24  }
   0x5   : > { %s32_s9 = sadd.s32 1, %s1771_s28  ;;  %s200_s10 = sadd.s32 1, %s1763_s26 }
   0x6   : > { %p34_p0 = scmp.ge.s32.totalorder %s32_s9, 2  ;;  %p210_p1 = scmp.ne.s32.totalorder %s1763_s26, %s1759_s25 }
   0x7   : > { %p211_p2 = scmp.eq.s32.totalorder %s1442_s30, 1  ;;  %p216_p3 = scmp.ne.s32.totalorder %s1759_s25, %s1755_s24 }
   0x8   : > { %s2648_s9 = smov (%p34_p0, %s32_s9), 0  ;;  %p217_p5 = scmp.eq.s32.totalorder %s1443_s8, 1 }
   0x9   : > { %p1863_p4 = por %p211_p2, %p210_p1  ;;  %s197_s12 = ssub.s32 %s1771_s28, %s2648_s9 }
   0xa   : > { %p1446_p6 = scmp.ge.s32.totalorder %s1775_s29, 1  ;;  %p198_p7 = scmp.eq.s32.totalorder %s197_s12, 0 }
   0xb   : > { %p1870_p8 = por %p217_p5, %p216_p3  ;;  %p276_p9 = scmp.lt.s32.totalorder %s1775_s29, 3 }
   0xc   : > { %s1876_s14 = scalar_select %p198_p7, %s1763_s26, %s200_s10  }
   0xd   : > { %p277_p10 = pnand %p1446_p6, %p276_p9 }
   0xf   : > { %280 = sbr.rel (%p277_p10) target bundleno = 717 (0x2cd), region = 48 }
  0x16   : > { %p321_p11 = scmp.lt.s32.totalorder %s1767_s27, 1  ;;  %v2622_v0 = vmov 0   ;;  %v2624_v18 = vmov 1   ;;  %v1779_v24 = vmov 3   ;;  %v2619_v25 = vmov 2   ;;  %v1134_v28 = vld [vmem:[%s2615_s5] sm:$0xff] }
  0x17   : > { %1655 = vset.pattern.permute.xlu1 %v2622_v0  ;;  %1654 = vset.pattern.permute.xlu0 %v2622_v0  ;;  %v1135_v29 = vld [vmem:[%s2615_s5 + $0x8] sm:$0xff]  ;;  %v1136_v33 = vld [vmem:[%s2615_s5 + $0x10] sm:$0xff]  ;;  %v1137_v34 = vld [vmem:[%s2615_s5 + $0x18] sm:$0xff]  ;;  %v460_v37 = vlaneseq  ;;  %s318_s30 = sand.u32 1, %s1759_s25  }
  0x18   : > { %s1882_s15 = scalar_select %p321_p11, %s1767_s27, 1  ;;  %v1546_v30 = vpack.c.bf16 %v1135_v29, %v1134_v28  ;;  %v1550_v35 = vpack.c.bf16 %v1137_v34, %v1136_v33  ;;  %v1138_v40 = vld [vmem:[%s2615_s5 + $0x20] sm:$0xff]  ;;  %v1139_v41 = vld [vmem:[%s2615_s5 + $0x28] sm:$0xff]  ;;  %v1140_v46 = vld [vmem:[%s2615_s5 + $0x30] sm:$0xff] }
  0x19   : > { %v1554_v42 = vpack.c.bf16 %v1139_v41, %v1138_v40  ;;  %v2044_v43 = vshrl.u32 %v460_v37, 7  ;;  %v1141_v47 = vld [vmem:[%s2615_s5 + $0x38] sm:$0xff]  ;;  %v2064_v50 = vld [vmem:[%s2613_s3] sm:$0xf]  ;;  %v1143_v54 = vld [vmem:[%s2615_s5 + $0x48] sm:$0xff]  ;;  %s2548_s8 = scalar_lea.vmem [#allocation2], %s318_s30 }
  0x1a   : > { %s1456_s16 = sshll.u32 %s1882_s15, 7  ;;  %1547 = vmatprep.subr.bf16.mxu0 %v1546_v30  ;;  %1578 = vmatprep.subr.bf16.mxu1 %v1546_v30  ;;  %v1558_v48 = vpack.c.bf16 %v1141_v47, %v1140_v46  ;;  %v1142_v53 = vld [vmem:[%s2615_s5 + $0x40] sm:$0xff]  ;;  %v1144_v59 = vld [vmem:[%s2615_s5 + $0x50] sm:$0xff]  ;;  %v1145_v60 = vld [vmem:[%s2615_s5 + $0x58] sm:$0xff]  ;;  %s1453_s15 = sshll.u32 %s1767_s27, 4 }
  0x1b   : > { %s338_s19 = scalar_lea.vmem %s2611_s1, %s1456_s16  ;;  %s1938_s22 = scalar_lea.vmem %s2610_s0, %s1456_s16  ;;  %1549 = vmatpush3.bf16.msra.mxu0 %v1546_v30  ;;  %1586 = vmatpush3.bf16.msra.mxu1 %v1546_v30  ;;  %v462_v49 = vsub.s32 0, %v2044_v43  ;;  %v1562_v55 = vpack.c.bf16 %v1143_v54, %v1142_v53  ;;  %v1566_v62 = vpack.c.bf16 %v1145_v60, %v1144_v59  ;;  %v2621_v60 = vsub.s32 2, %v2044_v43 }
  0x1c   : > { %v1890_v1 = vld [vmem:[%s338_s19 + $0x10] sm:$0xff]  ;;  %v1892_v2 = vld [vmem:[%s338_s19] sm:$0xff]  ;;  %v1896_v3 = vld [vmem:[%s338_s19 + $0x18] sm:$0xff]  ;;  %1551 = vmatprep.subr.bf16.mxu0 %v1550_v35  ;;  %1579 = vmatprep.subr.bf16.mxu1 %v1550_v35  ;;  %s1355_s16 = sshll.u32 %s2548_s8, 4  ;;  %s1343_s20 = scalar_lea.sflag [#allocation3], %s318_s30  ;;  %s2562_s16 = int_to_ptr.vmem [resolvable:$true] %s1355_s16 }
  0x1d   : > { %392 = vperm.xlu1 %1655, %v1890_v1   ;;  %382 = vperm.xlu0 %1654, %v1892_v2   ;;  %v1898_v4 = vld [vmem:[%s338_s19 + $0x8] sm:$0xff]  ;;  %v1904_v6 = vld [vmem:[%s338_s19 + $0x20] sm:$0xff]  ;;  %v1908_v7 = vld [vmem:[%s338_s19 + $0x38] sm:$0xff]  ;;  %v2081_v56 = vrot.slane %v2064_v50, %v462_v49  ;;  %s1697_s21 = scalar_lea.vmem %s2562_s16, 16  ;;  %s1782_s27 = smov [#allocation2]  }
  0x1e   : > { %v1902_v5 = vld [vmem:[%s338_s19 + $0x28] sm:$0xff]  ;;  %v1910_v8 = vld [vmem:[%s338_s19 + $0x30] sm:$0xff]  ;;  %v372_v10 = vld [vmem:[%s338_s19 + $0x40] sm:$0xff]  ;;  %p1698_p12 = scmp.ne.s32.totalorder %s2562_s16, %s1697_s21 }
  0x1f   : > { %v1914_v9 = vld [vmem:[%s338_s19 + $0x48] sm:$0xff]  ;;  %v1917_v11 = vld [vmem:[%s338_s19 + $0x58] sm:$0xff]  ;;  %v1919_v12 = vld [vmem:[%s338_s19 + $0x50] sm:$0xff]  ;;  %1553 = vmatpush3.bf16.msra.mxu0 %v1550_v35  ;;  %1587 = vmatpush3.bf16.msra.mxu1 %v1550_v35 }
  0x20   : > { %v1923_v13 = vld [vmem:[%s338_s19 + $0x68] sm:$0xff]  ;;  %v1925_v14 = vld [vmem:[%s338_s19 + $0x60] sm:$0xff]  ;;  %v1929_v15 = vld [vmem:[%s338_s19 + $0x78] sm:$0xff]  ;;  %1555 = vmatprep.subr.bf16.mxu0 %v1554_v42  ;;  %1580 = vmatprep.subr.bf16.mxu1 %v1554_v42  ;;  %p1699_p13 = pnand %p1698_p12, %p1863_p4 }
  0x21   : > { %397 = vperm.xlu1 %1655, %v1896_v3   ;;  %387 = vperm.xlu0 %1654, %v1898_v4   ;;  %v1931_v16 = vld [vmem:[%s338_s19 + $0x70] sm:$0xff]  ;;  %v348_v17 = vld [vmem:[%s1938_s22] sm:$0xff]  ;;  %v349_v19 = vld [vmem:[%s1938_s22 + $0x8] sm:$0xff]  ;;  %s2560_s19 = scalar_lea.hbm %s2617_s7, %s1453_s15 }
  0x22   : > { %v1948_v20 = vld [vmem:[%s1938_s22 + $0x40] sm:$0xff]  ;;  %v1953_v21 = vld [vmem:[%s1938_s22 + $0x50] sm:$0xff]  ;;  %v1958_v22 = vld [vmem:[%s1938_s22 + $0x58] sm:$0xff]  ;;  %p1700_p0 = pneg %p1699_p13 }
  0x23   : > { %v1962_v23 = vld [vmem:[%s1938_s22 + $0x68] sm:$0xff]  ;;  %v1996_v26 = vld [vmem:[%s1938_s22 + $0x10] sm:$0xff]  ;;  %v2004_v27 = vld [vmem:[%s1938_s22 + $0x20] sm:$0xff]  ;;  %1557 = vmatpush3.bf16.msra.mxu0 %v1554_v42  ;;  %1588 = vmatpush3.bf16.msra.mxu1 %v1554_v42 }
  0x24   : > { %v2015_v31 = vld [vmem:[%s1938_s22 + $0x18] sm:$0xff]  ;;  %v2020_v32 = vld [vmem:[%s1938_s22 + $0x60] sm:$0xff]  ;;  %v2030_v36 = vld [vmem:[%s1938_s22 + $0x48] sm:$0xff]  ;;  %1559 = vmatprep.subr.bf16.mxu0 %v1558_v48  ;;  %1581 = vmatprep.subr.bf16.mxu1 %v1558_v48 }
  0x25   : > { %407 = vperm.xlu1 %1655, %v1902_v5   ;;  %402 = vperm.xlu0 %1654, %v1904_v6   ;;  %v2167_v53 = vld [vmem:[%s1938_s22 + $0x78] sm:$0xff] }
  0x27   : > { %1561 = vmatpush3.bf16.msra.mxu0 %v1558_v48  ;;  %1589 = vmatpush3.bf16.msra.mxu1 %v1558_v48 }
  0x28   : > { %1563 = vmatprep.subr.bf16.mxu0 %v1562_v55  ;;  %1582 = vmatprep.subr.bf16.mxu1 %v1562_v55 }
  0x29   : > { %417 = vperm.xlu1 %1655, %v1908_v7   ;;  %412 = vperm.xlu0 %1654, %v1910_v8  }
  0x2b   : > { %1565 = vmatpush3.bf16.msra.mxu0 %v1562_v55  ;;  %1590 = vmatpush3.bf16.msra.mxu1 %v1562_v55 }
  0x2c   : > { %1567 = vmatprep.subr.bf16.mxu0 %v1566_v62  ;;  %1583 = vmatprep.subr.bf16.mxu1 %v1566_v62 }
  0x2d   : > { %427 = vperm.xlu1 %1655, %v1914_v9   ;;  %422 = vperm.xlu0 %1654, %v372_v10  }
  0x2f   : > { %1569 = vmatpush3.bf16.msra.mxu0 %v1566_v62  ;;  %1591 = vmatpush3.bf16.msra.mxu1 %v1566_v62  ;;  %v746_v62 = vsub.s32 3, %v2044_v43 }
  0x31   : > { %437 = vperm.xlu1 %1655, %v1917_v11   ;;  %432 = vperm.xlu0 %1654, %v1919_v12  }
  0x35   : > { %447 = vperm.xlu1 %1655, %v1923_v13   ;;  %442 = vperm.xlu0 %1654, %v1925_v14  }
  0x39   : > { %457 = vperm.xlu1 %1655, %v1929_v15   ;;  %452 = vperm.xlu0 %1654, %v1931_v16  }
  0x3d   : > { %1656 = vset.pattern.permute.xlu1 %v2624_v18  ;;  %782 = vperm.xlu0 %1654, %v348_v17  }
  0x3e   : > { %485 = vperm.xlu1 %1656, %v1898_v4  }
  0x41   : > { %787 = vperm.xlu0 %1654, %v349_v19  }
  0x42   : > { %489 = vperm.xlu1 %1656, %v1890_v1  }
  0x45   : > { %822 = vperm.xlu0 %1654, %v1948_v20  }
  0x46   : > { %497 = vperm.xlu1 %1656, %v1904_v6  }
  0x49   : > { %832 = vperm.xlu0 %1654, %v1953_v21  }
  0x4a   : > { %505 = vperm.xlu1 %1656, %v1910_v8  }
  0x4d   : > { %837 = vperm.xlu0 %1654, %v1958_v22  }
  0x4e   : > { %513 = vperm.xlu1 %1656, %v372_v10  }
  0x51   : > { %847 = vperm.xlu0 %1654, %v1962_v23  }
  0x52   : > { %521 = vperm.xlu1 %1656, %v1919_v12  }
  0x55   : > { %1685 = vset.pattern.permute.xlu0 %v1779_v24 }
  0x56   : > { %1657 = vset.pattern.permute.xlu1 %v2619_v25  ;;  %713 = vperm.xlu0 %1685, %v372_v10  }
  0x57   : > { %581 = vperm.xlu1 %1657, %v1892_v2  }
  0x5a   : > { %717 = vperm.xlu0 %1685, %v1914_v9  }
  0x5b   : > { %1658 = vset.pattern.permute.xlu1 %v1779_v24 }
  0x5c   : > { %681 = vperm.xlu1 %1658, %v1892_v2  }
  0x5e   : > { %697 = vperm.xlu0 %1685, %v1904_v6  }
  0x60   : > { %685 = vperm.xlu1 %1658, %v1898_v4  }
  0x62   : > { %725 = vperm.xlu0 %1685, %v1917_v11  }
  0x64   : > { %1659 = vset.pattern.permute.xlu1 %v2619_v25 }
  0x65   : > { %613 = vperm.xlu1 %1659, %v372_v10  }
  0x66   : > { %733 = vperm.xlu0 %1685, %v1923_v13  }
  0x69   : > { %593 = vperm.xlu1 %1659, %v1896_v3  }
  0x6a   : > { %737 = vperm.xlu0 %1685, %v1931_v16  }
  0x6d   : > { %617 = vperm.xlu1 %1659, %v1914_v9  }
  0x6e   : > { %741 = vperm.xlu0 %1685, %v1929_v15  }
  0x71   : > { %1660 = vset.pattern.permute.xlu1 %v1779_v24 }
  0x72   : > { %689 = vperm.xlu1 %1660, %v1890_v1   ;;  %1688 = vset.pattern.permute.xlu0 %v2619_v25 }
  0x73   : > { %585 = vperm.xlu0 %1688, %v1898_v4  }
  0x76   : > { %1661 = vset.pattern.permute.xlu1 %v2624_v18 }
  0x77   : > { %897 = vperm.xlu1 %1661, %v348_v17   ;;  %589 = vperm.xlu0 %1688, %v1890_v1  }
  0x7b   : > { %1662 = vset.pattern.permute.xlu1 %v1779_v24  ;;  %597 = vperm.xlu0 %1688, %v1904_v6  }
  0x7c   : > { %693 = vperm.xlu1 %1662, %v1896_v3  }
  0x7f   : > { %625 = vperm.xlu0 %1688, %v1917_v11  }
  0x80   : > { %1663 = vset.pattern.permute.xlu1 %v2624_v18 }
  0x81   : > { %901 = vperm.xlu1 %1663, %v349_v19  }
  0x83   : > { %1001 = vperm.xlu0 %1688, %v349_v19  }
  0x85   : > { %1664 = vset.pattern.permute.xlu1 %v2619_v25 }
  0x86   : > { %621 = vperm.xlu1 %1664, %v1919_v12  }
  0x87   : > { %605 = vperm.xlu0 %1688, %v1910_v8  }
  0x8a   : > { %1665 = vset.pattern.permute.xlu1 %v2622_v0 }
  0x8b   : > { %792 = vperm.xlu1 %1665, %v1996_v26   ;;  %609 = vperm.xlu0 %1688, %v1908_v7  }
  0x8f   : > { %1666 = vset.pattern.permute.xlu1 %v2619_v25  ;;  %637 = vperm.xlu0 %1688, %v1931_v16  }
  0x90   : > { %997 = vperm.xlu1 %1666, %v348_v17   ;;  %v1149_v17 = vld [vmem:[%s2615_s5 + $0x78] sm:$0xff] }
  0x93   : > { %1013 = vperm.xlu0 %1688, %v2004_v27  }
  0x94   : > { %601 = vperm.xlu1 %1666, %v1902_v5  }
  0x97   : > { %641 = vperm.xlu0 %1688, %v1929_v15  }
  0x98   : > { %1667 = vset.pattern.permute.xlu1 %v2622_v0 }
  0x99   : > { %797 = vperm.xlu1 %1667, %v2015_v31  }
  0x9b   : > { %1045 = vperm.xlu0 %1688, %v2020_v32  }
  0x9c   : > { %v2033_v38 = vpop.permute.xlu1 %392  ;;  %v2035_v39 = vpop.permute.xlu0 %382 }
  0x9d   : > { %827 = vperm.xlu1 %1667, %v2030_v36  }
  0x9f   : > { %1049 = vperm.xlu0 %1688, %v1962_v23  }
  0xa0   : > { %v2047_v44 = vpop.permute.xlu1 %397  ;;  %v2049_v45 = vpop.permute.xlu0 %387 }
  0xa1   : > { %1668 = vset.pattern.permute.xlu1 %v2624_v18 }
  0xa2   : > { %529 = vperm.xlu1 %1668, %v1925_v14  }
  0xa3   : > { %1693 = vset.pattern.permute.xlu0 %v2624_v18 }
  0xa4   : > { %v2066_v51 = vpop.permute.xlu1 %407  ;;  %481 = vperm.xlu0 %1693, %v1892_v2   ;;  %v2069_v52 = vpop.permute.xlu0 %402  ;;  %v1146_v2 = vld [vmem:[%s2615_s5 + $0x60] sm:$0xff] }
  0xa6   : > { %1669 = vset.pattern.permute.xlu1 %v1779_v24 }
  0xa7   : > { %721 = vperm.xlu1 %1669, %v1919_v12   ;;  %v1148_v12 = vld [vmem:[%s2615_s5 + $0x70] sm:$0xff] }
  0xa8   : > { %v2084_v57 = vpop.permute.xlu1 %417  ;;  %493 = vperm.xlu0 %1693, %v1896_v3   ;;  %v413_v58 = vpop.permute.xlu0 %412  ;;  %v1147_v3 = vld [vmem:[%s2615_s5 + $0x68] sm:$0xff]  ;;  %v1574_v28 = vpack.c.bf16 %v1149_v17, %v1148_v12 }
  0xa9   : > { %v2094_v61 = vmul.f32 %v2081_v56, %v413_v58  ;;  %v1570_v4 = vpack.c.bf16 %v1147_v3, %v1146_v2  ;;  %v2618_v58 = vsub.s32 1, %v2044_v43  ;;  %v2201_v3 = vld [vmem:[%s2612_s2] sm:$0x7] }
  0xaa   : > { %v2211_v17 = vrot.slane %v2201_v3, %v462_v49 }
  0xab   : > { %1670 = vset.pattern.permute.xlu1 %v2624_v18  ;;  %1571 = vmatprep.subr.bf16.mxu0 %v1570_v4 }
  0xac   : > { %v2097_v63 = vpop.permute.xlu1 %427  ;;  %905 = vperm.xlu1 %1670, %v1996_v26   ;;  %501 = vperm.xlu0 %1693, %v1902_v5   ;;  %v2101_v1 = vpop.permute.xlu0 %422 }
  0xad   : > { %1584 = vmatprep.subr.bf16.mxu1 %v1570_v4  ;;  %1573 = vmatpush3.bf16.msra.mxu0 %v1570_v4 }
  0xae   : > { %1592 = vmatpush3.bf16.msra.mxu1 %v1570_v4  ;;  %1575 = vmatprep.subr.bf16.mxu0 %v1574_v28  ;;  %v472_v4 = vmul.f32 %v2081_v56, %v2101_v1 }
  0xaf   : > { %1585 = vmatprep.subr.bf16.mxu1 %v1574_v28 }
  0xb0   : > { %v2109_v6 = vpop.permute.xlu1 %437  ;;  %533 = vperm.xlu1 %1670, %v1923_v13   ;;  %509 = vperm.xlu0 %1693, %v1908_v7   ;;  %v433_v10 = vpop.permute.xlu0 %432 }
  0xb1   : > { %v2120_v19 = vmul.f32 %v2081_v56, %v433_v10  ;;  %1577 = vmatpush3.bf16.msra.mxu0 %v1574_v28 }
  0xb2   : > { %1593 = vmatpush3.bf16.msra.mxu1 %v1574_v28  ;;  %v2219_v28 = vrot.slane %v2064_v50, %v746_v62 }
  0xb4   : > { %v2122_v29 = vpop.permute.xlu1 %447  ;;  %1671 = vset.pattern.permute.xlu1 %v1779_v24  ;;  %517 = vperm.xlu0 %1693, %v1914_v9   ;;  %v443_v30 = vpop.permute.xlu0 %442 }
  0xb5   : > { %701 = vperm.xlu1 %1671, %v1902_v5   ;;  %v2128_v33 = vmul.f32 %v2081_v56, %v443_v30 }
  0xb8   : > { %v2130_v34 = vpop.permute.xlu1 %457  ;;  %525 = vperm.xlu0 %1693, %v1917_v11   ;;  %v453_v35 = vpop.permute.xlu0 %452 }
  0xb9   : > { %1672 = vset.pattern.permute.xlu1 %v2624_v18  ;;  %v2135_v37 = vmul.f32 %v2081_v56, %v453_v35 }
  0xba   : > { %909 = vperm.xlu1 %1672, %v2015_v31  }
  0xbc   : > { %929 = vperm.xlu0 %1693, %v1948_v20   ;;  %v2139_v5 = vpop.permute.xlu0 %782 }
  0xbd   : > { %v2141_v9 = vpop.permute.xlu1 %485 }
  0xbe   : > { %933 = vperm.xlu1 %1672, %v2030_v36  }
  0xc0   : > { %537 = vperm.xlu0 %1693, %v1931_v16   ;;  %v2145_v40 = vpop.permute.xlu0 %787 }
  0xc1   : > { %v2147_v11 = vpop.permute.xlu1 %489 }
  0xc2   : > { %1673 = vset.pattern.permute.xlu1 %v2619_v25 }
  0xc3   : > { %629 = vperm.xlu1 %1673, %v1925_v14  }
  0xc4   : > { %913 = vperm.xlu0 %1693, %v2004_v27   ;;  %v823_v41 = vpop.permute.xlu0 %822 }
  0xc5   : > { %v2152_v42 = vpop.permute.xlu1 %497  ;;  %v872_v49 = vmul.f32 %v2211_v17, %v823_v41  ;;  %v465_v41 = vmul.f32 %v2081_v56, %v2049_v45  ;;  %v865_v45 = vmul.f32 %v2211_v17, %v2145_v40 }
  0xc7   : > { %1674 = vset.pattern.permute.xlu1 %v2622_v0 }
  0xc8   : > { %802 = vperm.xlu1 %1674, %v2004_v27   ;;  %541 = vperm.xlu0 %1693, %v1929_v15   ;;  %v2157_v16 = vpop.permute.xlu0 %832 }
  0xc9   : > { %v2159_v46 = vpop.permute.xlu1 %505 }
  0xcc   : > { %1675 = vset.pattern.permute.xlu1 %v2619_v25  ;;  %v2162_v47 = vpop.permute.xlu0 %837  ;;  %949 = vperm.xlu0 %1693, %v1962_v23   ;;  %v2180_v23 = vld [vmem:[%s1938_s22 + $0x28] sm:$0xff] }
  0xcd   : > { %v514_v48 = vpop.permute.xlu1 %513  ;;  %1005 = vperm.xlu1 %1675, %v1996_v26  }
  0xd0   : > { %v2169_v54 = vpop.permute.xlu0 %847  ;;  %957 = vperm.xlu0 %1693, %v2167_v53  }
  0xd1   : > { %v2172_v15 = vpop.permute.xlu1 %521  ;;  %1029 = vperm.xlu1 %1675, %v1948_v20  }
  0xd4   : > { %1696 = vset.pattern.permute.xlu0 %v2619_v25 }
  0xd5   : > { %633 = vperm.xlu1 %1675, %v1923_v13   ;;  %v714_v27 = vpop.permute.xlu0 %713  ;;  %v2193_v13 = vrot.slane %v2064_v50, %v2618_v58 }
  0xd6   : > { %v2177_v55 = vpop.permute.xlu1 %581  ;;  %v756_v35 = vmul.f32 %v2219_v28, %v714_v27 }
  0xd7   : > { %v556_v10 = vmul.f32 %v2193_v13, %v514_v48 }
  0xd9   : > { %1676 = vset.pattern.permute.xlu1 %v2622_v0  ;;  %v2183_v26 = vpop.permute.xlu0 %717  ;;  %v572_v30 = vadd.f32 %v556_v10, %v472_v4  ;;  %v549_v10 = vmul.f32 %v2193_v13, %v2141_v9 }
  0xda   : > { %807 = vperm.xlu1 %1676, %v2180_v23  }
  0xdb   : > { %v2187_v59 = vpop.permute.xlu1 %681 }
  0xdd   : > { %v698_v20 = vpop.permute.xlu0 %697 }
  0xde   : > { %1677 = vset.pattern.permute.xlu1 %v2619_v25 }
  0xdf   : > { %v686_v2 = vpop.permute.xlu1 %685  ;;  %1009 = vperm.xlu1 %1677, %v2015_v31   ;;  %v2216_v31 = vrot.slane %v2064_v50, %v2621_v60 }
  0xe0   : > { %v749_v9 = vmul.f32 %v2219_v28, %v686_v2 }
  0xe1   : > { %v2206_v12 = vpop.permute.xlu0 %725 }
  0xe3   : > { %1033 = vperm.xlu1 %1677, %v2030_v36  }
  0xe4   : > { %v614_v1 = vpop.permute.xlu1 %613 }
  0xe5   : > { %v656_v48 = vmul.f32 %v2216_v31, %v614_v1  ;;  %v2224_v58 = vpop.permute.xlu0 %733  ;;  %v565_v1 = vadd.f32 %v549_v10, %v465_v41 }
  0xe7   : > { %v672_v25 = vadd.f32 %v656_v48, %v572_v30  ;;  %1678 = vset.pattern.permute.xlu1 %v1779_v24  ;;  %v550_v30 = vmul.f32 %v2193_v13, %v2147_v11 }
  0xe8   : > { %v2228_v60 = vpop.permute.xlu1 %593  ;;  %705 = vperm.xlu1 %1678, %v1910_v8  }
  0xe9   : > { %v772_v50 = vadd.f32 %v756_v35, %v672_v25  ;;  %v2231_v62 = vpop.permute.xlu0 %737  ;;  %v466_v35 = vmul.f32 %v2081_v56, %v2033_v38  ;;  %v552_v38 = vmul.f32 %v2193_v13, %v2152_v42 }
  0xeb   : > { %v2233_v36 = vadd.f32 %v872_v49, %v772_v50  ;;  %v468_v49 = vmul.f32 %v2081_v56, %v2069_v52  ;;  %v566_v41 = vadd.f32 %v550_v30, %v466_v35 }
  0xec   : > { %v2235_v4 = vpop.permute.xlu1 %617  ;;  %729 = vperm.xlu1 %1678, %v1925_v14  }
  0xed   : > { %v2238_v27 = vpop.permute.xlu0 %741 }
  0xf0   : > { %1679 = vset.pattern.permute.xlu1 %v2624_v18 }
  0xf1   : > { %v690_v8 = vpop.permute.xlu1 %689  ;;  %937 = vperm.xlu1 %1679, %v1953_v21  }
  0xf2   : > { %v586_v25 = vpop.permute.xlu0 %585  ;;  %v750_v2 = vmul.f32 %v2219_v28, %v690_v8 }
  0xf3   : > { %v649_v14 = vmul.f32 %v2216_v31, %v586_v25 }
  0xf5   : > { %v665_v48 = vadd.f32 %v649_v14, %v565_v1  ;;  %1680 = vset.pattern.permute.xlu1 %v1779_v24  ;;  %v752_v1 = vmul.f32 %v2219_v28, %v698_v20  ;;  %v558_v20 = vmul.f32 %v2193_v13, %v2172_v15 }
  0xf6   : > { %709 = vperm.xlu1 %1680, %v1908_v7   ;;  %v2258_v50 = vpop.permute.xlu1 %897  ;;  %v590_v11 = vpop.permute.xlu0 %589  ;;  %v568_v7 = vadd.f32 %v552_v38, %v468_v49 }
  0xf7   : > { %v765_v10 = vadd.f32 %v749_v9, %v665_v48  ;;  %v650_v40 = vmul.f32 %v2216_v31, %v590_v11  ;;  %v2280_v48 = vld [vmem:[%s1938_s22 + $0x30] sm:$0xff]  ;;  %v554_v11 = vmul.f32 %v2193_v13, %v2159_v46  ;;  %v574_v38 = vadd.f32 %v558_v20, %v2120_v19 }
  0xf9   : > { %v666_v25 = vadd.f32 %v650_v40, %v566_v41  ;;  %v2264_v24 = vadd.f32 %v865_v45, %v765_v10 }
  0xfa   : > { %1681 = vset.pattern.permute.xlu1 %v2624_v18  ;;  %v598_v52 = vpop.permute.xlu0 %597 }
  0xfb   : > { %v652_v30 = vmul.f32 %v2216_v31, %v598_v52  ;;  %917 = vperm.xlu1 %1681, %v2180_v23   ;;  %v2270_v42 = vpop.permute.xlu1 %693  ;;  %v2272_v14 = vadd.f32 %v750_v2, %v666_v25  ;;  %v570_v2 = vadd.f32 %v554_v11, %v2094_v61 }
  0xfd   : > { %v668_v35 = vadd.f32 %v652_v30, %v568_v7 }
  0xfe   : > { %v2274_v8 = vpop.permute.xlu0 %625 }
  0xff   : > { %941 = vperm.xlu1 %1681, %v1958_v22   ;;  %v2277_v45 = vadd.f32 %v752_v1, %v668_v35  ;;  %v2628_v1 = vmov 2   ;;  %v2304_v35 = vld [vmem:[%s1938_s22 + $0x38] sm:$0xff] }
 0x100   : > { %v902_v9 = vpop.permute.xlu1 %901 }
 0x102   : > { %v1002_v49 = vpop.permute.xlu0 %1001 }
 0x103   : > { %1682 = vset.pattern.permute.xlu1 %v2622_v0 }
 0x104   : > { %812 = vperm.xlu1 %1682, %v2280_v48  }
 0x105   : > { %v622_v41 = vpop.permute.xlu1 %621 }
 0x106   : > { %v658_v10 = vmul.f32 %v2216_v31, %v622_v41  ;;  %v606_v40 = vpop.permute.xlu0 %605 }
 0x107   : > { %v654_v25 = vmul.f32 %v2216_v31, %v606_v40 }
 0x108   : > { %v674_v15 = vadd.f32 %v658_v10, %v574_v38  ;;  %842 = vperm.xlu1 %1682, %v2020_v32  }
 0x109   : > { %v2293_v52 = vadd.f32 %v654_v25, %v570_v2  ;;  %v2633_v25 = vsub.s32 1, %v2044_v43 }
 0x10a   : > { %v2295_v46 = vpop.permute.xlu1 %792  ;;  %v2297_v7 = vpop.permute.xlu0 %609 }
 0x10b   : > { %2627 = vst [vmem:[#allocation5_spill] sm:$0xff] %v2293_v52 }
 0x10c   : > { %1683 = vset.pattern.permute.xlu1 %v2628_v1 }
 0x10d   : > { %1037 = vperm.xlu1 %1683, %v1953_v21  }
 0x10e   : > { %v2301_v19 = vpop.permute.xlu0 %637 }
 0x10f   : > { %v998_v30 = vpop.permute.xlu1 %997 }
 0x111   : > { %1684 = vset.pattern.permute.xlu1 %v2622_v0 }
 0x112   : > { %817 = vperm.xlu1 %1684, %v2304_v35   ;;  %v2308_v61 = vpop.permute.xlu0 %1013 }
 0x113   : > { %v602_v20 = vpop.permute.xlu1 %601 }
 0x116   : > { %1686 = vset.pattern.permute.xlu1 %v2628_v1  ;;  %v2311_v11 = vpop.permute.xlu0 %641 }
 0x117   : > { %1017 = vperm.xlu1 %1686, %v2180_v23   ;;  %v2329_v23 = vrot.slane %v2201_v3, %v2633_v25  ;;  %v648_v25 = vmul.f32 %v2216_v31, %v2177_v55  ;;  %v874_v55 = vmul.f32 %v2211_v17, %v2157_v16 }
 0x118   : > { %v2314_v41 = vpop.permute.xlu1 %797 }
 0x119   : > { %2629 = vst [vmem:[#allocation6_spill] sm:$0xff] %v2314_v41  ;;  %v964_v16 = vmul.f32 %v2329_v23, %v2258_v50  ;;  %v653_v50 = vmul.f32 %v2216_v31, %v602_v20 }
 0x11a   : > { %v2316_v21 = vpop.permute.xlu0 %1045 }
 0x11b   : > { %2630 = vst [vmem:[#allocation7_spill] sm:$0xff] %v2316_v21  ;;  %1041 = vperm.xlu1 %1686, %v1958_v22   ;;  %v464_v22 = vmul.f32 %v2081_v56, %v2035_v39 }
 0x11c   : > { %v2319_v38 = vpop.permute.xlu1 %827 }
 0x11d   : > { %2631 = vst [vmem:[#allocation8_spill] sm:$0xff] %v2319_v38 }
 0x11e   : > { %v2321_v10 = vpop.permute.xlu0 %1049 }
 0x11f   : > { %2632 = vst [vmem:[#allocation9_spill] sm:$0xff] %v2321_v10  ;;  %1687 = vset.pattern.permute.xlu1 %v2624_v18  ;;  %v965_v18 = vmul.f32 %v2329_v23, %v902_v9 }
 0x120   : > { %921 = vperm.xlu1 %1687, %v2280_v48  }
 0x121   : > { %v530_v40 = vpop.permute.xlu1 %529 }
 0x122   : > { %v560_v2 = vmul.f32 %v2193_v13, %v530_v40  ;;  %v2634_v40 = vsub.s32 2, %v2044_v43 }
 0x123   : > { %v482_v0 = vpop.permute.xlu0 %481 }
 0x124   : > { %v2334_v52 = vadd.f32 %v560_v2, %v2128_v33  ;;  %v548_v21 = vmul.f32 %v2193_v13, %v482_v0  ;;  %945 = vperm.xlu1 %1687, %v2020_v32   ;;  %v2342_v38 = vrot.slane %v2201_v3, %v2634_v40  ;;  %v467_v0 = vmul.f32 %v2081_v56, %v2047_v44 }
 0x125   : > { %v748_v32 = vmul.f32 %v2219_v28, %v2187_v59  ;;  %v981_v3 = vadd.f32 %v965_v18, %v2264_v24  ;;  %v864_v2 = vmul.f32 %v2211_v17, %v2139_v5  ;;  %v651_v44 = vmul.f32 %v2216_v31, %v2228_v60 }
 0x126   : > { %v564_v10 = vadd.f32 %v548_v21, %v464_v22  ;;  %v722_v41 = vpop.permute.xlu1 %721  ;;  %v1065_v21 = vmul.f32 %v2342_v38, %v1002_v49  ;;  %v2362_v22 = vld [vmem:[%s1938_s22 + $0x70] sm:$0xff]  ;;  %v469_v40 = vmul.f32 %v2081_v56, %v2066_v51  ;;  %v751_v5 = vmul.f32 %v2219_v28, %v2270_v42  ;;  %s1701_s22 = sshll.u32 %s1782_s27, 4  ;;  %s1702_s22 = int_to_ptr.vmem [resolvable:$false] %s1701_s22 }
 0x127   : > { %v758_v39 = vmul.f32 %v2219_v28, %v722_v41  ;;  %v494_v33 = vpop.permute.xlu0 %493  ;;  %v1064_v51 = vmul.f32 %v2342_v38, %v998_v30  ;;  %v655_v30 = vmul.f32 %v2216_v31, %v2297_v7  ;;  %s1703_s23 = scalar_lea.vmem %s1702_s22, 32  ;;  %p1704_p1 = scmp.lt.s32.totalorder %s2562_s16, %s1702_s22 }
 0x128   : > { %v664_v9 = vadd.f32 %v648_v25, %v564_v10  ;;  %v551_v43 = vmul.f32 %v2193_v13, %v494_v33  ;;  %925 = vperm.xlu1 %1687, %v2304_v35   ;;  %v2635_v25 = vmov 0   ;;  %v1081_v33 = vadd.f32 %v1065_v21, %v981_v3  ;;  %p1705_p2 = scmp.lt.s32.totalorder %s1703_s23, %s1697_s21 }
 0x129   : > { %v774_v41 = vadd.f32 %v758_v39, %v674_v15 }
 0x12a   : > { %v764_v59 = vadd.f32 %v748_v32, %v664_v9  ;;  %v567_v10 = vadd.f32 %v551_v43, %v467_v0  ;;  %v2382_v32 = vld [vmem:[%s2614_s4] ss:$0 sm:$0xff]  ;;  %v471_v43 = vmul.f32 %v2081_v56, %v2084_v57  ;;  %p1706_p3 = por %p1705_p2, %p1704_p1 }
 0x12b   : > { %v2368_v18 = vpop.permute.xlu1 %905  ;;  %v502_v24 = vpop.permute.xlu0 %501  ;;  %v2370_v49 = vadd.f32 %v874_v55, %v774_v41  ;;  %v477_v55 = vmul.f32 %v2081_v56, %v2122_v29 }
 0x12c   : > { %v667_v15 = vadd.f32 %v651_v44, %v567_v10  ;;  %v553_v60 = vmul.f32 %v2193_v13, %v502_v24  ;;  %1689 = vset.pattern.permute.xlu1 %v2635_v25  ;;  %v880_v39 = vadd.f32 %v864_v2, %v764_v59  ;;  %v1103_v59 = vadd.f32 %v2382_v32, %v1081_v33  ;;  %p1707_p5 = pnand %p1706_p3, %p1700_p0 }
 0x12d   : > { %852 = vperm.xlu1 %1689, %v2362_v22   ;;  %v757_v33 = vmul.f32 %v2219_v28, %v2183_v26 }
 0x12e   : > { %v569_v0 = vadd.f32 %v553_v60, %v469_v40  ;;  %v980_v42 = vadd.f32 %v964_v16, %v880_v39  ;;  %v2384_v9 = vadd.f32 %v751_v5, %v667_v15  ;;  %v473_v40 = vmul.f32 %v2081_v56, %v2097_v63 }
 0x12f   : > { %v534_v3 = vpop.permute.xlu1 %533  ;;  %v510_v20 = vpop.permute.xlu0 %509  ;;  %v1119_v39 = vmax.f32 %v1103_v59, 0.0 }
 0x130   : > { %v561_v21 = vmul.f32 %v2193_v13, %v534_v3  ;;  %v555_v41 = vmul.f32 %v2193_v13, %v510_v20  ;;  %v669_v2 = vadd.f32 %v653_v50, %v569_v0  ;;  %v1080_v44 = vadd.f32 %v1064_v51, %v980_v42 }
 0x131   : > { %1690 = vset.pattern.permute.xlu1 %v2628_v1  ;;  %v475_v0 = vmul.f32 %v2081_v56, %v2109_v6  ;;  %v659_v42 = vmul.f32 %v2216_v31, %v2274_v8  ;;  %v875_v8 = vmul.f32 %v2211_v17, %v2162_v47 }
 0x132   : > { %v2396_v10 = vadd.f32 %v561_v21, %v477_v55  ;;  %v571_v57 = vadd.f32 %v555_v41, %v471_v43  ;;  %1021 = vperm.xlu1 %1690, %v2280_v48   ;;  %v1102_v29 = vadd.f32 %v2382_v32, %v1080_v44  ;;  %v657_v48 = vmul.f32 %v2216_v31, %v2235_v4 }
 0x133   : > { %v518_v7 = vpop.permute.xlu0 %517  ;;  %v2636_v44 = vmov 1  }
 0x134   : > { %v557_v16 = vmul.f32 %v2193_v13, %v518_v7  ;;  %v702_v24 = vpop.permute.xlu1 %701  ;;  %v1118_v5 = vmax.f32 %v1102_v29, 0.0  ;;  %v2403_v15 = vadd.f32 %v655_v30, %v571_v57 }
 0x135   : > { %v753_v60 = vmul.f32 %v2219_v28, %v702_v24  ;;  %v479_v24 = vmul.f32 %v2081_v56, %v2130_v34  ;;  %v763_v56 = vmul.f32 %v2219_v28, %v2238_v27  ;;  %v1068_v34 = vmul.f32 %v2342_v38, %v2308_v61 }
 0x136   : > { %v573_v51 = vadd.f32 %v557_v16, %v473_v40  ;;  %1691 = vset.pattern.permute.xlu1 %v2635_v25  ;;  %1522 = vmatprep.mubr.f32.mxu0 %v1118_v5  ;;  %v759_v25 = vmul.f32 %v2219_v28, %v2206_v12 }
 0x137   : > { %v2411_v63 = vadd.f32 %v753_v60, %v669_v2  ;;  %857 = vperm.xlu1 %1691, %v2167_v53   ;;  %1523 = vmatmul.mubr.f32.vlgmr.msra.gmra.mrb[0].mxu0 %v1119_v39  ;;  %v526_v50 = vpop.permute.xlu0 %525  ;;  %v662_v2 = vmul.f32 %v2216_v31, %v2301_v19  ;;  %v663_v60 = vmul.f32 %v2216_v31, %v2311_v11 }
 0x138   : > { %v673_v26 = vadd.f32 %v657_v48, %v573_v51  ;;  %v559_v43 = vmul.f32 %v2193_v13, %v526_v50 }
 0x139   : > { %v2419_v4 = vpop.permute.xlu1 %909 }
 0x13a   : > { %v575_v55 = vadd.f32 %v559_v43, %v475_v0  ;;  %v2423_v30 = vadd.f32 %v757_v33, %v673_v26 }
 0x13b   : > { %1692 = vset.pattern.permute.xlu1 %v2628_v1  ;;  %v930_v3 = vpop.permute.xlu0 %929 }
 0x13c   : > { %v675_v20 = vadd.f32 %v659_v42, %v575_v55  ;;  %1025 = vperm.xlu1 %1692, %v2304_v35   ;;  %v762_v35 = vmul.f32 %v2219_v28, %v2231_v62  ;;  %v972_v0 = vmul.f32 %v2329_v23, %v930_v3 }
 0x13d   : > { %v2427_v6 = vpop.permute.xlu1 %933 }
 0x13e   : > { %v775_v21 = vadd.f32 %v759_v25, %v675_v20 }
 0x13f   : > { %v538_v41 = vpop.permute.xlu0 %537 }
 0x140   : > { %v562_v12 = vmul.f32 %v2193_v13, %v538_v41  ;;  %1694 = vset.pattern.permute.xlu1 %v2636_v44  ;;  %v2435_v59 = vadd.f32 %v875_v8, %v775_v21  ;;  %v761_v21 = vmul.f32 %v2219_v28, %v2224_v58  ;;  %v967_v58 = vmul.f32 %v2329_v23, %v2419_v4 }
 0x141   : > { %953 = vperm.xlu1 %1694, %v2362_v22  }
 0x142   : > { %v578_v57 = vadd.f32 %v562_v12, %v2135_v37  ;;  %v630_v29 = vpop.permute.xlu1 %629  ;;  %v866_v37 = vmul.f32 %v2211_v17, %v2295_v46 }
 0x143   : > { %v660_v47 = vmul.f32 %v2216_v31, %v630_v29  ;;  %v914_v7 = vpop.permute.xlu0 %913  ;;  %v2638_v29 = vld [vmem:[#allocation9_spill] sm:$0xff] }
 0x144   : > { %v678_v40 = vadd.f32 %v662_v2, %v578_v57  ;;  %v882_v11 = vadd.f32 %v866_v37, %v2272_v14  ;;  %v2637_v57 = vld [vmem:[#allocation6_spill] sm:$0xff] }
 0x145   : > { %v2443_v19 = vadd.f32 %v660_v47, %v2334_v52  ;;  %1695 = vset.pattern.permute.xlu1 %v2628_v1  ;;  %v968_v52 = vmul.f32 %v2329_v23, %v914_v7  ;;  %v1077_v47 = vmul.f32 %v2342_v38, %v2638_v29 }
 0x146   : > { %1053 = vperm.xlu1 %1695, %v2362_v22   ;;  %v2447_v16 = vadd.f32 %v762_v35, %v678_v40  ;;  %v966_v22 = vmul.f32 %v2329_v23, %v2368_v18 }
 0x147   : > { %v803_v62 = vpop.permute.xlu1 %802  ;;  %v542_v5 = vpop.permute.xlu0 %541 }
 0x148   : > { %v868_v39 = vmul.f32 %v2211_v17, %v803_v62  ;;  %v563_v1 = vmul.f32 %v2193_v13, %v542_v5  ;;  %v982_v13 = vadd.f32 %v966_v22, %v882_v11  ;;  %v973_v5 = vmul.f32 %v2329_v23, %v2427_v6 }
 0x14a   : > { %v884_v46 = vadd.f32 %v868_v39, %v2277_v45  ;;  %v579_v33 = vadd.f32 %v563_v1, %v479_v24  ;;  %1057 = vperm.xlu1 %1695, %v2167_v53   ;;  %v988_v45 = vadd.f32 %v972_v0, %v2233_v36  ;;  %v877_v36 = vmul.f32 %v2211_v17, %v2169_v54  ;;  %v2639_v24 = vld [vmem:[#allocation8_spill] sm:$0xff] }
 0x14b   : > { %v950_v8 = vpop.permute.xlu0 %949  ;;  %v873_v54 = vmul.f32 %v2211_v17, %v2639_v24 }
 0x14c   : > { %v984_v48 = vadd.f32 %v968_v52, %v884_v46  ;;  %v679_v51 = vadd.f32 %v663_v60, %v579_v33  ;;  %v1006_v50 = vpop.permute.xlu1 %1005  ;;  %v977_v35 = vmul.f32 %v2329_v23, %v950_v8 }
 0x14d   : > { %v1066_v18 = vmul.f32 %v2342_v38, %v1006_v50  ;;  %v889_v39 = vadd.f32 %v873_v54, %v2423_v30 }
 0x14e   : > { %v1084_v42 = vadd.f32 %v1068_v34, %v984_v48  ;;  %v2469_v27 = vadd.f32 %v763_v56, %v679_v51 }
 0x14f   : > { %v1082_v26 = vadd.f32 %v1066_v18, %v982_v13 }
 0x150   : > { %v1030_v61 = vpop.permute.xlu1 %1029  ;;  %v1106_v22 = vadd.f32 %v2382_v32, %v1084_v42 }
 0x151   : > { %v1072_v43 = vmul.f32 %v2342_v38, %v1030_v61  ;;  %v1104_v53 = vadd.f32 %v2382_v32, %v1082_v26 }
 0x152   : > { %v1122_v11 = vmax.f32 %v1106_v22, 0.0 }
 0x153   : > { %v1120_v14 = vmax.f32 %v1104_v53, 0.0  ;;  %v1088_v25 = vadd.f32 %v1072_v43, %v988_v45 }
 0x154   : > { %v634_v55 = vpop.permute.xlu1 %633 }
 0x155   : > { %v661_v20 = vmul.f32 %v2216_v31, %v634_v55  ;;  %1525 = vmatprep.mubr.f32.mxu0 %v1120_v14  ;;  %v1110_v3 = vadd.f32 %v2382_v32, %v1088_v25  ;;  %v867_v31 = vmul.f32 %v2211_v17, %v2637_v57 }
 0x157   : > { %v677_v41 = vadd.f32 %v661_v20, %v2396_v10  ;;  %v1126_v2 = vmax.f32 %v1110_v3, 0.0  ;;  %v883_v10 = vadd.f32 %v867_v31, %v2384_v9  ;;  %v989_v9 = vadd.f32 %v973_v5, %v889_v39 }
 0x159   : > { %v777_v12 = vadd.f32 %v761_v21, %v677_v41  ;;  %v808_v44 = vpop.permute.xlu1 %807  ;;  %1534 = vmatprep.mubr.f32.mxu1 %v1126_v2  ;;  %v983_v62 = vadd.f32 %v967_v58, %v883_v10 }
 0x15a   : > { %v869_v25 = vmul.f32 %v2211_v17, %v808_v44 }
 0x15b   : > { %v893_v7 = vadd.f32 %v877_v36, %v777_v12 }
 0x15c   : > { %v885_v21 = vadd.f32 %v869_v25, %v2411_v63 }
 0x15d   : > { %v993_v40 = vadd.f32 %v977_v35, %v893_v7 }
 0x15e   : > { %v1010_v37 = vpop.permute.xlu1 %1009 }
 0x15f   : > { %v2493_v60 = vadd.f32 %v1077_v47, %v993_v40  ;;  %v1067_v52 = vmul.f32 %v2342_v38, %v1010_v37 }
 0x161   : > { %v1083_v1 = vadd.f32 %v1067_v52, %v983_v62  ;;  %v2640_v62 = vld [vmem:[#allocation7_spill] sm:$0xff] }
 0x162   : > { %v1034_v4 = vpop.permute.xlu1 %1033  ;;  %v1076_v5 = vmul.f32 %v2342_v38, %v2640_v62 }
 0x163   : > { %v1073_v56 = vmul.f32 %v2342_v38, %v1034_v4  ;;  %v1105_v34 = vadd.f32 %v2382_v32, %v1083_v1  ;;  %v1115_v4 = vadd.f32 %v2382_v32, %v2493_v60 }
 0x165   : > { %v1089_v46 = vadd.f32 %v1073_v56, %v989_v9  ;;  %v1121_v33 = vmax.f32 %v1105_v34, 0.0 }
 0x167   : > { %v706_v48 = vpop.permute.xlu1 %705  ;;  %1526 = vmatmul.mubr.f32.gmra.mrb[2].mxu0 %v1121_v33  ;;  %v1111_v6 = vadd.f32 %v2382_v32, %v1089_v46  ;;  %v1131_v46 = vmax.f32 %v1115_v4, 0.0  ;;  %v2641_v33 = vld [vmem:[#allocation5_spill] sm:$0xff] }
 0x168   : > { %1528 = vmatprep.mubr.f32.mxu0 %v1122_v11  ;;  %v754_v22 = vmul.f32 %v2219_v28, %v706_v48 }
 0x169   : > { %v1127_v51 = vmax.f32 %v1111_v6, 0.0 }
 0x16a   : > { %v770_v11 = vadd.f32 %v754_v22, %v2641_v33 }
 0x16b   : > { %v730_v50 = vpop.permute.xlu1 %729  ;;  %1535 = vmatmul.mubr.f32.vlgmr.msra.gmra.mrb[0].mxu1 %v1127_v51 }
 0x16c   : > { %v760_v58 = vmul.f32 %v2219_v28, %v730_v50 }
 0x16e   : > { %v776_v24 = vadd.f32 %v760_v58, %v2443_v19 }
 0x170   : > { %v938_v30 = vpop.permute.xlu1 %937 }
 0x171   : > { %v974_v61 = vmul.f32 %v2329_v23, %v938_v30 }
 0x173   : > { %v990_v43 = vadd.f32 %v974_v61, %v2370_v49 }
 0x175   : > { %v710_v13 = vpop.permute.xlu1 %709 }
 0x176   : > { %v755_v48 = vmul.f32 %v2219_v28, %v710_v13 }
 0x178   : > { %v771_v61 = vadd.f32 %v755_v48, %v2403_v15 }
 0x17a   : > { %v918_v0 = vpop.permute.xlu1 %917 }
 0x17b   : > { %v969_v3 = vmul.f32 %v2329_v23, %v918_v0 }
 0x17d   : > { %v985_v2 = vadd.f32 %v969_v3, %v885_v21 }
 0x17e   : > { %v942_v18 = vpop.permute.xlu1 %941 }
 0x17f   : > { %v975_v36 = vmul.f32 %v2329_v23, %v942_v18 }
 0x181   : > { %v991_v57 = vadd.f32 %v975_v36, %v2435_v59 }
 0x183   : > { %v813_v42 = vpop.permute.xlu1 %812 }
 0x184   : > { %v870_v19 = vmul.f32 %v2211_v17, %v813_v42 }
 0x186   : > { %v886_v51 = vadd.f32 %v870_v19, %v770_v11 }
 0x187   : > { %v843_v26 = vpop.permute.xlu1 %842 }
 0x188   : > { %v876_v10 = vmul.f32 %v2211_v17, %v843_v26 }
 0x18a   : > { %v892_v59 = vadd.f32 %v876_v10, %v776_v24 }
 0x18c   : > { %v1038_v45 = vpop.permute.xlu1 %1037 }
 0x18d   : > { %v1074_v53 = vmul.f32 %v2342_v38, %v1038_v45 }
 0x18f   : > { %v1090_v14 = vadd.f32 %v1074_v53, %v990_v43 }
 0x191   : > { %v818_v55 = vpop.permute.xlu1 %817  ;;  %v1112_v20 = vadd.f32 %v2382_v32, %v1090_v14 }
 0x192   : > { %v871_v18 = vmul.f32 %v2211_v17, %v818_v55 }
 0x193   : > { %v1128_v8 = vmax.f32 %v1112_v20, 0.0 }
 0x194   : > { %v887_v53 = vadd.f32 %v871_v18, %v771_v61 }
 0x195   : > { %1537 = vmatprep.mubr.f32.mxu1 %v1128_v8 }
 0x196   : > { %v1018_v41 = vpop.permute.xlu1 %1017 }
 0x197   : > { %v1069_v49 = vmul.f32 %v2342_v38, %v1018_v41 }
 0x199   : > { %v1085_v12 = vadd.f32 %v1069_v49, %v985_v2  ;;  %v958_v2 = vpop.permute.xlu0 %957 }
 0x19a   : > { %v1042_v35 = vpop.permute.xlu1 %1041 }
 0x19b   : > { %v1075_v44 = vmul.f32 %v2342_v38, %v1042_v35  ;;  %v1107_v31 = vadd.f32 %v2382_v32, %v1085_v12 }
 0x19d   : > { %v1091_v29 = vadd.f32 %v1075_v44, %v991_v57  ;;  %v1123_v47 = vmax.f32 %v1107_v31, 0.0  ;;  %v979_v57 = vmul.f32 %v2329_v23, %v958_v2 }
 0x19f   : > { %v922_v63 = vpop.permute.xlu1 %921  ;;  %1529 = vmatmul.mubr.f32.gmra.mrb[4].mxu0 %v1123_v47  ;;  %v1113_v7 = vadd.f32 %v2382_v32, %v1091_v29 }
 0x1a0   : > { %v970_v6 = vmul.f32 %v2329_v23, %v922_v63 }
 0x1a1   : > { %v1129_v40 = vmax.f32 %v1113_v7, 0.0 }
 0x1a2   : > { %v986_v30 = vadd.f32 %v970_v6, %v886_v51 }
 0x1a3   : > { %v946_v54 = vpop.permute.xlu1 %945  ;;  %1538 = vmatmul.mubr.f32.gmra.mrb[2].mxu1 %v1129_v40 }
 0x1a4   : > { %v976_v37 = vmul.f32 %v2329_v23, %v946_v54 }
 0x1a6   : > { %v992_v52 = vadd.f32 %v976_v37, %v892_v59  ;;  %v1452_v59 = vld [vmem:[%s2616_s6] ss:$0 sm:$0xff] }
 0x1a7   : > { %v926_v39 = vpop.permute.xlu1 %925 }
 0x1a8   : > { %v1092_v1 = vadd.f32 %v1076_v5, %v992_v52  ;;  %v971_v45 = vmul.f32 %v2329_v23, %v926_v39 }
 0x1aa   : > { %v1114_v9 = vadd.f32 %v2382_v32, %v1092_v1  ;;  %v987_v25 = vadd.f32 %v971_v45, %v887_v53 }
 0x1ac   : > { %v853_v56 = vpop.permute.xlu1 %852  ;;  %v1130_v34 = vmax.f32 %v1114_v9, 0.0 }
 0x1ad   : > { %v878_v28 = vmul.f32 %v2211_v17, %v853_v56 }
 0x1ae   : > { %1540 = vmatprep.mubr.f32.mxu1 %v1130_v34 }
 0x1af   : > { %1541 = vmatmul.mubr.f32.gmra.mrb[4].mxu1 %v1131_v46  ;;  %v894_v41 = vadd.f32 %v878_v28, %v2447_v16 }
 0x1b1   : > { %v1022_v50 = vpop.permute.xlu1 %1021 }
 0x1b2   : > { %v1070_v60 = vmul.f32 %v2342_v38, %v1022_v50 }
 0x1b4   : > { %v1086_v0 = vadd.f32 %v1070_v60, %v986_v30 }
 0x1b6   : > { %v858_v42 = vpop.permute.xlu1 %857  ;;  %v1108_v26 = vadd.f32 %v2382_v32, %v1086_v0 }
 0x1b7   : > { %v879_v8 = vmul.f32 %v2211_v17, %v858_v42 }
 0x1b8   : > { %v1124_v43 = vmax.f32 %v1108_v26, 0.0 }
 0x1b9   : > { %v895_v49 = vadd.f32 %v879_v8, %v2469_v27 }
 0x1ba   : > { %1531 = vmatprep.mubr.f32.mxu0 %v1124_v43 }
 0x1bb   : > { %v1026_v14 = vpop.permute.xlu1 %1025  ;;  %v995_v17 = vadd.f32 %v979_v57, %v895_v49 }
 0x1bc   : > { %v1071_v20 = vmul.f32 %v2342_v38, %v1026_v14 }
 0x1be   : > { %v1087_v3 = vadd.f32 %v1071_v20, %v987_v25 }
 0x1c0   : > { %v954_v13 = vpop.permute.xlu1 %953  ;;  %v1109_v55 = vadd.f32 %v2382_v32, %v1087_v3 }
 0x1c1   : > { %v978_v21 = vmul.f32 %v2329_v23, %v954_v13  ;;  %v1781_v23 = vmov -inf  }
 0x1c2   : > { %v1125_v15 = vmax.f32 %v1109_v55, 0.0  ;;  %347 = vst [vmem:[%s2548_s8] sm:$0x1] %v1781_v23 }
 0x1c3   : > { %v994_v12 = vadd.f32 %v978_v21, %v894_v41 }
 0x1c4   : > { %1532 = vmatmul.mubr.f32.gmra.mrb[6].mxu0 %v1125_v15 }
 0x1c5   : > { %v1054_v36 = vpop.permute.xlu1 %1053 }
 0x1c6   : > { %v1078_v35 = vmul.f32 %v2342_v38, %v1054_v36 }
 0x1c8   : > { %v1094_v44 = vadd.f32 %v1078_v35, %v994_v12 }
 0x1c9   : > { %v1058_v31 = vpop.permute.xlu1 %1057 }
 0x1ca   : > { %v1079_v29 = vmul.f32 %v2342_v38, %v1058_v31  ;;  %v1116_v47 = vadd.f32 %v2382_v32, %v1094_v44 }
 0x1cc   : > { %v1095_v16 = vadd.f32 %v1079_v29, %v995_v17  ;;  %v1132_v58 = vmax.f32 %v1116_v47, 0.0 }
 0x1ce   : > { %1543 = vmatprep.mubr.f32.mxu1 %v1132_v58  ;;  %v1117_v63 = vadd.f32 %v2382_v32, %v1095_v16 }
 0x1d0   : > { %v1133_v27 = vmax.f32 %v1117_v63, 0.0 }
 0x1d2   : > { %1544 = vmatmul.mubr.f32.gmra.mrb[6].mxu1 %v1133_v27 }
 0x20a   : > { %v1524_v7 = vpop.f32.mrb[0].mxu0 }
 0x20b   : > { %v1223_v10 = vpop.f32.mrb[1].mxu0  ;;  %v1229_v32 = vadd.f32 %v1524_v7, %v1452_v59 }
 0x20c   : > { %v1224_v37 = vadd.f32 %v1452_v59, %v1223_v10 }
 0x20d   : > { %v1303_v22 = vmax.f32 %v1229_v32, 0.0 }
 0x20e   : > { %v1302_v19 = vmax.f32 %v1224_v37, 0.0 }
 0x23a   : > { %v1527_v40 = vpop.f32.mrb[2].mxu0 }
 0x23b   : > { %v1233_v38 = vpop.f32.mrb[3].mxu0  ;;  %v1239_v53 = vadd.f32 %v1527_v40, %v1452_v59 }
 0x23c   : > { %v1234_v14 = vadd.f32 %v1452_v59, %v1233_v38 }
 0x23d   : > { %v1305_v8 = vmax.f32 %v1239_v53, 0.0 }
 0x23e   : > { %v1536_v24 = vpop.f32.mrb[0].mxu1  ;;  %v1304_v15 = vmax.f32 %v1234_v14, 0.0 }
 0x23f   : > { %v1263_v54 = vpop.f32.mrb[1].mxu1  ;;  %v1269_v5 = vadd.f32 %v1536_v24, %v1452_v59 }
 0x240   : > { %v1264_v1 = vadd.f32 %v1452_v59, %v1263_v54  ;;  %v1339_v54 = vld [vmem:[%s2548_s8] sm:$0x1] }
 0x241   : > { %v1311_v46 = vmax.f32 %v1269_v5, 0.0 }
 0x242   : > { %v1310_v6 = vmax.f32 %v1264_v1, 0.0 }
 0x272   : > { %v1530_v62 = vpop.f32.mrb[4].mxu0 }
 0x273   : > { %v1249_v52 = vadd.f32 %v1530_v62, %v1452_v59  ;;  %v1243_v39 = vpop.f32.mrb[5].mxu0 }
 0x274   : > { %v1244_v4 = vadd.f32 %v1452_v59, %v1243_v39 }
 0x275   : > { %v1307_v9 = vmax.f32 %v1249_v52, 0.0 }
 0x276   : > { %v1306_v56 = vmax.f32 %v1244_v4, 0.0  ;;  %v1539_v34 = vpop.f32.mrb[2].mxu1 }
 0x277   : > { %v1319_v33 = vmax.f32 %v1303_v22, %v1307_v9  ;;  %v1273_v11 = vpop.f32.mrb[3].mxu1  ;;  %v1279_v20 = vadd.f32 %v1539_v34, %v1452_v59 }
 0x278   : > { %v1318_v51 = vmax.f32 %v1302_v19, %v1306_v56  ;;  %v1274_v13 = vadd.f32 %v1452_v59, %v1273_v11 }
 0x279   : > { %v1323_v50 = vmax.f32 %v1319_v33, %v1311_v46  ;;  %v1313_v2 = vmax.f32 %v1279_v20, 0.0 }
 0x27a   : > { %v1322_v30 = vmax.f32 %v1318_v51, %v1310_v6  ;;  %v1312_v49 = vmax.f32 %v1274_v13, 0.0 }
 0x282   : > { %v1542_v60 = vpop.f32.mrb[4].mxu1 }
 0x283   : > { %v1289_v48 = vadd.f32 %v1542_v60, %v1452_v59  ;;  %v1283_v0 = vpop.f32.mrb[5].mxu1 }
 0x284   : > { %v1284_v18 = vadd.f32 %v1452_v59, %v1283_v0 }
 0x285   : > { %v1315_v42 = vmax.f32 %v1289_v48, 0.0 }
 0x286   : > { %v1314_v26 = vmax.f32 %v1284_v18, 0.0 }
 0x287   : > { %v1327_v61 = vmax.f32 %v1323_v50, %v1315_v42 }
 0x288   : > { %v1326_v45 = vmax.f32 %v1322_v30, %v1314_v26 }
 0x28a   : > { %v1330_v43 = vmax.f32 %v1326_v45, %v1327_v61 }
 0x297   : > { %v1533_v25 = vpop.f32.mrb[6].mxu0 }
 0x298   : > { %v1259_v3 = vadd.f32 %v1533_v25, %v1452_v59  ;;  %v1253_v28 = vpop.f32.mrb[7].mxu0 }
 0x299   : > { %v1254_v55 = vadd.f32 %v1452_v59, %v1253_v28 }
 0x29a   : > { %v1309_v21 = vmax.f32 %v1259_v3, 0.0 }
 0x29b   : > { %v1308_v41 = vmax.f32 %v1254_v55, 0.0 }
 0x29c   : > { %v1321_v36 = vmax.f32 %v1305_v8, %v1309_v21 }
 0x29d   : > { %v1320_v12 = vmax.f32 %v1304_v15, %v1308_v41 }
 0x29e   : > { %v1325_v35 = vmax.f32 %v1321_v36, %v1313_v2 }
 0x29f   : > { %v1324_v57 = vmax.f32 %v1320_v12, %v1312_v49 }
 0x2a5   : > { %v1545_v44 = vpop.f32.mrb[6].mxu1 }
 0x2a6   : > { %v1299_v31 = vadd.f32 %v1545_v44, %v1452_v59  ;;  %v1293_v17 = vpop.f32.mrb[7].mxu1 }
 0x2a7   : > { %v1294_v29 = vadd.f32 %v1452_v59, %v1293_v17 }
 0x2a8   : > { %v1317_v47 = vmax.f32 %v1299_v31, 0.0 }
 0x2a9   : > { %v1316_v16 = vmax.f32 %v1294_v29, 0.0 }
 0x2aa   : > { %v1329_v58 = vmax.f32 %v1325_v35, %v1317_v47 }
 0x2ab   : > { %v1328_v63 = vmax.f32 %v1324_v57, %v1316_v16 }
 0x2ad   : > { %v1331_v27 = vmax.f32 %v1328_v63, %v1329_v58 }
 0x2af   : > { %v1332_v7 = vmax.f32 %v1330_v43, %v1331_v27 }
 0x2b1   : > { %v1333_v10 = vrot.slane %v1332_v7, 4 }
 0x2b3   : > { %v1334_v23 = vmax.f32 %v1332_v7, %v1333_v10 }
 0x2b5   : > { %v1335_v40 = vrot.slane %v1334_v23, 2 }
 0x2b7   : > { %v1336_v38 = vmax.f32 %v1334_v23, %v1335_v40 }
 0x2b9   : > { %v1337_v24 = vrot.slane %v1336_v38, 1 }
 0x2bb   : > { %v1338_v32 = vmax.f32 %v1336_v38, %v1337_v24 }
 0x2bd   : > { %v1340_v37 = vmax.f32 %v1339_v54, %v1338_v32 }
 0x2bf   : > { %1341 = vst [vmem:[%s2548_s8] sm:$0x1] %v1340_v37 }
 0x2c0   : > { %1710 = shalt.err (!%p1707_p5)
}
 0x2c1   : > { %s1711_s30 = scalar_lea.hbm %s2560_s19, 16  ;;  %s1715_s12 = scalar_lea.hbm %s2617_s7, 32 }
 0x2c2   : > { %p1712_p6 = scmp.ne.s32.totalorder %s2560_s19, %s1711_s30  ;;  %p1716_p10 = scmp.lt.u32.totalorder %s2560_s19, %s2617_s7 }
 0x2c3   : > { %p1717_p11 = scmp.lt.u32.totalorder %s1715_s12, %s1711_s30  ;;  %p1719_p13 = scmp.lt.u32.totalorder %s1711_s30, %s2560_s19 }
 0x2c4   : > { %p1713_p7 = pnand %p1712_p6, %p1863_p4 }
 0x2c5   : > { %p1718_p12 = por %p1717_p11, %p1716_p10 }
 0x2c6   : > { %p1714_p9 = pneg %p1713_p7 }
 0x2c7   : > { %p1720_p0 = por %p1719_p13, %p1718_p12 }
 0x2c9   : > { %p1721_p1 = pnand %p1720_p0, %p1714_p9 }
 0x2cb   : > { %1724 = shalt.err (!%p1721_p1)
}
 0x2cc   : > { %1594 = dma.vmem_to_hbm [thread:$0]  (%p1863_p4), %s2562_s16, 16, %s2560_s19, %s1343_s20  }
 0x2cd PF: > { %p1600_p2 = scmp.ge.s32.totalorder %s1775_s29, 2  ;;  %s1367_s18 = sand.u32 1, %s1755_s24  }
 0x2ce   : > { %s1368_s21 = scalar_lea.sflag [#allocation3], %s1367_s18 }
 0x2cf   : > { %p1597_p3 = pnand %p1600_p2, %p1870_p8 }
 0x2d1   : > { %1750 = dma.done.wait (!%p1597_p3), %s1368_s21, 16  }
 0x2d2   : > { %1752 = vsyncadd (!%p1597_p3), %s1368_s21, 4294967280  ;;  %s20_s29 = sadd.s32 1, %s1775_s29   ;;  %s2642_s24 = smov %s1759_s25 }
 0x2d3   : > { %p17_p5 = scmp.ge.s32.totalorder %s20_s29, 4   ;;  %s2643_s25 = smov %s1763_s26 }
 0x2d4   : > { %s2644_s26 = smov %s1876_s14  ;;  %s2645_s27 = smov %s1771_s28 }
 0x2d5   : > { %s2646_s28 = smov %s2648_s9  ;;  %19 = sbr.rel (!%p17_p5) target bundleno = 4 (0x4), region = 90 }
 0x2dc   :  { %1372 = vsyncpa [#allocation3], 1 }
 0x2dd   :  { %1374 = vsyncpa [#allocation3 + $0x1], 1 }

</bundles_post_ra>
